<compile_context>
chip_gen: v7x
topology: tpu7x:2x2x1
jax: 0.10.0
libtpu: 0.0.40
codegen_flags: <defaults>
</compile_context>

<pallas_src>
from functools import partial

import jax
import jax.numpy as jnp
from jax.experimental import pallas as pl
from jax.experimental.pallas import tpu as pltpu


# ------------------------- Pallas kernel -------------------------

def _gen_network_kernel(
    emb_ref,      # (T*B, E)    token embeddings, row = t*B + b
    prob_ref,     # (B, C)      input_user_cluster_prob
    item_ref,     # (B, L)      input_item_hidden
    w_step_ref,   # (E+H, 4H)   fused per-step GRU weight [ih ; hh] x [r|z|n_i|n_h]
    wih4_ref,     # (E, 4H)     fused hoisted input-projection weight
    bias4_ref,    # (1, 4H)     fused gate biases [bih_r+bhh_r | bih_z+bhh_z | bih_n | bhh_n]
    w_hu_ref,     # (H, C)      w_attn @ user_embedding
    b_u_ref,      # (1, C)      b_attn @ user_embedding
    w_c2e_ref,    # (C, E)      user_embedding.T @ w_l2o
    b_l2o_ref,    # (1, E)      latent2output bias
    m_item_ref,   # (L, E+H+1)  [w_l2o | w_attn.T | b_attn.T]
    w_o2v_ref,    # (H, Vp)     output2vocab weight (vocab padded to 128)
    b_o2v_ref,    # (1, Vp)
    logits_ref,   # out (B*T, Vp), row = b*T + t
):
    B = prob_ref.shape[0]
    TB = emb_ref.shape[0]
    T = TB // B
    E = wih4_ref.shape[0]
    H = w_step_ref.shape[1] // 4
    f32 = jnp.float32

    def mm(a, w):
        return jnp.dot(a, w, preferred_element_type=f32)

    prob = prob_ref[...]
    item = item_ref[...]
    w_step = w_step_ref[...]
    w_hu = w_hu_ref[...]
    b_u = b_u_ref[...]
    w_c2e = w_c2e_ref[...]
    b_l2o = b_l2o_ref[...]

    # ---- prologue (off the recurrence critical path) ----
    # Hoisted input projection + ALL gate biases in one (T*B, E) @ (E, 4H) matmul.
    pre_e = mm(emb_ref[...], wih4_ref[...]) + bias4_ref[...]            # (T*B, 4H)
    # Item-side precompositions in one matmul: [item@w_l2o | item@w_attn.T | item@b_attn.T]
    item_pre = mm(item, m_item_ref[...])                                # (B, E+H+1)
    item_e = item_pre[:, :E]                                            # (B, E)
    w_item = item_pre[:, E:E + H]                                       # (B, H)
    b_i = item_pre[:, E + H:E + H + 1]                                  # (B, 1)
    # Initial user_item_hidden_i = latent2output(prob @ ue.T + item), precomposed.
    uih = mm(prob, w_c2e) + item_e + b_l2o                              # (B, E)
    h = jnp.zeros((B, H), f32)

    def gru_step(t, uih, h):
        # Single fused MXU issue for all six per-step gate matmuls; biases and
        # the embedding projection arrive via the pre_e slab.
        g = mm(jnp.concatenate([uih, h], axis=-1), w_step) + pre_e[t * B:(t + 1) * B]
        r = jax.nn.sigmoid(g[:, 0 * H:1 * H])
        z = jax.nn.sigmoid(g[:, 1 * H:2 * H])
        n = jnp.tanh(g[:, 2 * H:3 * H] + r * g[:, 3 * H:4 * H])
        return (1.0 - z) * n + z * h                                    # (B, H)

    def attn_update(h):
        # Collapsed attention: 2 tiny matmuls + elementwise (was 4 chained).
        uas = (mm(h, w_hu) + b_u) * prob                                # (B, C)
        ias = jnp.sum(h * w_item, axis=-1, keepdims=True) + b_i         # (B, 1)
        # softmax over concat([uas, ias], -1) without materializing the concat
        m = jnp.maximum(jnp.max(uas, axis=-1, keepdims=True), ias)
        eu = jnp.exp(uas - m)
        ei = jnp.exp(ias - m)
        inv = pl.reciprocal(jnp.sum(eu, axis=-1, keepdims=True) + ei, approx=True)
        return mm((eu * inv) * prob, w_c2e) + (ei * inv) * item_e + b_l2o   # (B, E)

    # ---- recurrence, fully unrolled (T small & static).  Attention update at
    # the start of steps 1..T-1 == reference math, skipping the dead final
    # update.  Hidden states stay register-resident. ----
    hs = []
    for t in range(T):
        if t > 0:
            uih = attn_update(h)
        h = gru_step(t, uih, h)
        hs.append(h)

    # ---- emit rows directly in b*T + t order (no wrapper transpose), then a
    # single lane-dense o2v matmul and one unmasked (B*T, Vp) store. ----
    out_rows = jnp.concatenate(
        [hs[t][b:b + 1, :] for b in range(B) for t in range(T)], axis=0)    # (B*T, H)
    logits_ref[...] = mm(out_rows, w_o2v_ref[...]) + b_o2v_ref[...]


# ------------------------- one-time parameter preparation -------------------------

def prepare_params(p):
    """Hoist all per-call parameter preprocessing: gate splits, weight fusion,
    attention precomposition, vocab padding.  Call once per parameter set."""
    E = p["w_l2o"].shape[1]
    H = p["w_hh"].shape[0]
    V = p["w_o2v"].shape[1]
    Vp = ((V + 127) // 128) * 128        # lane-dense vocab padding

    def gates(w):  # (in, 3H) -> three (in, H), PyTorch gate order r, z, n
        return w[:, :H], w[:, H:2 * H], w[:, 2 * H:3 * H]

    wih_r, wih_z, wih_n = gates(p["w_ih"])
    bih_r, bih_z, bih_n = gates(p["b_ih"])
    whh_r, whh_z, whh_n = gates(p["w_hh"])
    bhh_r, bhh_z, bhh_n = gates(p["b_hh"])

    zE = jnp.zeros((E, H), jnp.float32)
    zH = jnp.zeros((H, H), jnp.float32)
    wih4 = jnp.concatenate([wih_r, wih_z, wih_n, zE], axis=1)            # (E, 4H)
    whh4 = jnp.concatenate([whh_r, whh_z, zH, whh_n], axis=1)            # (H, 4H)
    w_step = jnp.concatenate([wih4, whh4], axis=0)                       # (E+H, 4H)
    bias4 = jnp.concatenate(
        [bih_r + bhh_r, bih_z + bhh_z, bih_n, bhh_n], axis=1)            # (1, 4H)

    ue = p["user_embedding"]                                             # (L, C)
    with jax.default_matmul_precision("float32"):   # one-time, keep precomposition exact
        w_hu = p["w_attn"] @ ue                                          # (H, C)
        b_u = p["b_attn"] @ ue                                           # (1, C)
        w_c2e = ue.T @ p["w_l2o"]                                        # (C, E)
    m_item = jnp.concatenate(
        [p["w_l2o"], p["w_attn"].T, p["b_attn"].T], axis=1)              # (L, E+H+1)

    w_o2v_pad = jnp.zeros((H, Vp), jnp.float32).at[:, :V].set(p["w_o2v"])
    b_o2v_pad = jnp.zeros((1, Vp), jnp.float32).at[:, :V].set(p["b_o2v"])

    return {
        "embedding": p["embedding"],
        "user_cluster_prob": p["user_cluster_prob"],
        "item_embedding": p["item_embedding"],
        "w_step": w_step, "wih4": wih4, "bias4": bias4,
        "w_hu": w_hu, "b_u": b_u, "w_c2e": w_c2e, "b_l2o": p["b_l2o"],
        "m_item": m_item,
        "w_o2v_pad": w_o2v_pad, "b_o2v_pad": b_o2v_pad,
    }


# ------------------------- per-call wrapper -------------------------

@partial(jax.jit, static_argnames=("vocab_size",))
def gen_network_forward(tokens, user_ids, item_ids, prep, *, vocab_size):
    """Returns logits (B*T, V), row order b*T + t (matching PyTorch view(-1, H))."""
    B, T = tokens.shape
    E = prep["wih4"].shape[0]
    Vp = prep["w_o2v_pad"].shape[1]

    # Per-call table lookups stay in plain JAX (gathers; no useful Pallas form here).
    emb_tb = prep["embedding"][tokens.T].reshape(T * B, E)    # t-major rows, no float transpose
    prob = prep["user_cluster_prob"][user_ids]                # (B, C)
    item_h = prep["item_embedding"][item_ids]                 # (B, L)

    vmem = pl.BlockSpec(memory_space=pltpu.MemorySpace.VMEM)
    inputs = (emb_tb, prob, item_h,
              prep["w_step"], prep["wih4"], prep["bias4"],
              prep["w_hu"], prep["b_u"], prep["w_c2e"], prep["b_l2o"],
              prep["m_item"], prep["w_o2v_pad"], prep["b_o2v_pad"])

    logits_pad = pl.pallas_call(
        _gen_network_kernel,
        out_shape=jax.ShapeDtypeStruct((B * T, Vp), jnp.float32),
        in_specs=[vmem] * len(inputs),
        out_specs=vmem,
    )(*inputs)

    return logits_pad[:, :vocab_size]


# ------------------------- pure-JAX reference -------------------------

def reference_forward(tokens, user_ids, item_ids, p):
    B, T = tokens.shape
    H = p["w_hh"].shape[0]
    emb = p["embedding"][tokens]                      # (B, T, E)
    prob = p["user_cluster_prob"][user_ids]           # (B, C)
    ue = p["user_embedding"]                          # (L, C)
    item_h = p["item_embedding"][item_ids]            # (B, L)

    uih = (prob @ ue.T + item_h) @ p["w_l2o"] + p["b_l2o"]
    h = jnp.zeros((B, H), jnp.float32)
    outs = []
    for t in range(T):
        x = emb[:, t, :] + uih
        gi = x @ p["w_ih"] + p["b_ih"]
        gh = h @ p["w_hh"] + p["b_hh"]
        r = jax.nn.sigmoid(gi[:, :H] + gh[:, :H])
        z = jax.nn.sigmoid(gi[:, H:2 * H] + gh[:, H:2 * H])
        n = jnp.tanh(gi[:, 2 * H:] + r * gh[:, 2 * H:])
        h = (1.0 - z) * n + z * h
        outs.append(h)
        ah = h @ p["w_attn"] + p["b_attn"]
        uas = (ah @ ue) * prob
        ias = jnp.sum(ah * item_h, axis=-1, keepdims=True)
        scores = jax.nn.softmax(jnp.concatenate([uas, ias], axis=-1), axis=-1)
        uih = (scores[:, :-1] * prob) @ ue.T + scores[:, -1:] * item_h
        uih = uih @ p["w_l2o"] + p["b_l2o"]
    out = jnp.stack(outs, axis=1)                     # (B, T, H)
    return out.reshape(B * T, H) @ p["w_o2v"] + p["b_o2v"]


# ------------------------- params / main -------------------------

def make_params(key, *, vocab_size, embedding_size, hidden_size, latent_size,
                num_clusters, num_items):
    ks = jax.random.split(key, 14)
    f = lambda k, shape: (0.1 * jax.random.normal(k, shape)).astype(jnp.float32)
    return {
        "embedding": f(ks[0], (vocab_size, embedding_size)),
        "user_cluster_prob": jax.nn.softmax(
            jax.random.normal(ks[1], (8, num_clusters)), axis=-1).astype(jnp.float32),
        "user_embedding": f(ks[2], (latent_size, num_clusters)),
        "item_embedding": f(ks[3], (num_items, latent_size)),
        # all linear weights stored as (in, out)
        "w_l2o": f(ks[4], (latent_size, embedding_size)),
        "b_l2o": f(ks[5], (1, embedding_size)),
        "w_ih": f(ks[6], (embedding_size, 3 * hidden_size)),
        "b_ih": f(ks[7], (1, 3 * hidden_size)),
        "w_hh": f(ks[8], (hidden_size, 3 * hidden_size)),
        "b_hh": f(ks[9], (1, 3 * hidden_size)),
        "w_attn": f(ks[10], (hidden_size, latent_size)),
        "b_attn": f(ks[11], (1, latent_size)),
        "w_o2v": f(ks[12], (hidden_size, vocab_size)),
        "b_o2v": f(ks[13], (1, vocab_size)),
    }


if __name__ == "__main__":
    B, T = 2, 8
    E, H, L, C, V = 32, 32, 16, 8, 64
    NUM_ITEMS = 10

    key = jax.random.PRNGKey(0)
    kp, kt, ku, ki = jax.random.split(key, 4)
    params = make_params(kp, vocab_size=V, embedding_size=E, hidden_size=H,
                         latent_size=L, num_clusters=C, num_items=NUM_ITEMS)
    prep = prepare_params(params)   # one-time weight fusion / precomposition / padding

    tokens = jax.random.randint(kt, (B, T), 0, V, dtype=jnp.int32)      # input_de_sequence
    user_ids = jax.random.randint(ku, (B,), 0, 8, dtype=jnp.int32)
    item_ids = jax.random.randint(ki, (B,), 0, NUM_ITEMS, dtype=jnp.int32)

    logits = jax.block_until_ready(
        gen_network_forward(tokens, user_ids, item_ids, prep, vocab_size=V))
    ref = reference_forward(tokens, user_ids, item_ids, params)

    assert logits.shape == (B * T, V), logits.shape
    assert jnp.allclose(logits, ref, atol=2e-3, rtol=2e-3), \
        float(jnp.max(jnp.abs(logits - ref)))
    print("KERNEL_OK")
</pallas_src>

<mosaic_0001>
module attributes {stable_mosaic.version = 11 : i64} {
  func.func @_gen_network_kernel(%arg0: memref<16x32xf32, #tpu.memory_space<vmem>>, %arg1: memref<2x8xf32, #tpu.memory_space<vmem>>, %arg2: memref<2x16xf32, #tpu.memory_space<vmem>>, %arg3: memref<64x128xf32, #tpu.memory_space<vmem>>, %arg4: memref<32x128xf32, #tpu.memory_space<vmem>>, %arg5: memref<1x128xf32, #tpu.memory_space<vmem>>, %arg6: memref<32x8xf32, #tpu.memory_space<vmem>>, %arg7: memref<1x8xf32, #tpu.memory_space<vmem>>, %arg8: memref<8x32xf32, #tpu.memory_space<vmem>>, %arg9: memref<1x32xf32, #tpu.memory_space<vmem>>, %arg10: memref<16x65xf32, #tpu.memory_space<vmem>>, %arg11: memref<32x128xf32, #tpu.memory_space<vmem>>, %arg12: memref<1x128xf32, #tpu.memory_space<vmem>>, %arg13: memref<16x128xf32, #tpu.memory_space<vmem>>) attributes {dimension_semantics = [], scalar_prefetch = 0 : i64, scratch_operands = 0 : i64, tpu.core_type = #tpu.core_type<tc>} {
    %c0 = arith.constant 0 : index
    %c0_0 = arith.constant 0 : index
    %0 = vector.load %arg1[%c0, %c0_0] : memref<2x8xf32, #tpu.memory_space<vmem>>, vector<2x8xf32>
    %c0_1 = arith.constant 0 : index
    %c0_2 = arith.constant 0 : index
    %1 = vector.load %arg2[%c0_1, %c0_2] : memref<2x16xf32, #tpu.memory_space<vmem>>, vector<2x16xf32>
    %c0_3 = arith.constant 0 : index
    %c0_4 = arith.constant 0 : index
    %2 = vector.load %arg3[%c0_3, %c0_4] : memref<64x128xf32, #tpu.memory_space<vmem>>, vector<64x128xf32>
    %c0_5 = arith.constant 0 : index
    %c0_6 = arith.constant 0 : index
    %3 = vector.load %arg6[%c0_5, %c0_6] : memref<32x8xf32, #tpu.memory_space<vmem>>, vector<32x8xf32>
    %c0_7 = arith.constant 0 : index
    %c0_8 = arith.constant 0 : index
    %4 = vector.load %arg7[%c0_7, %c0_8] : memref<1x8xf32, #tpu.memory_space<vmem>>, vector<1x8xf32>
    %c0_9 = arith.constant 0 : index
    %c0_10 = arith.constant 0 : index
    %5 = vector.load %arg8[%c0_9, %c0_10] : memref<8x32xf32, #tpu.memory_space<vmem>>, vector<8x32xf32>
    %c0_11 = arith.constant 0 : index
    %c0_12 = arith.constant 0 : index
    %6 = vector.load %arg9[%c0_11, %c0_12] : memref<1x32xf32, #tpu.memory_space<vmem>>, vector<1x32xf32>
    %c0_13 = arith.constant 0 : index
    %c0_14 = arith.constant 0 : index
    %7 = vector.load %arg0[%c0_13, %c0_14] : memref<16x32xf32, #tpu.memory_space<vmem>>, vector<16x32xf32>
    %c0_15 = arith.constant 0 : index
    %c0_16 = arith.constant 0 : index
    %8 = vector.load %arg4[%c0_15, %c0_16] : memref<32x128xf32, #tpu.memory_space<vmem>>, vector<32x128xf32>
    %cst = arith.constant dense<0.000000e+00> : vector<16x128xf32>
    %9 = tpu.matmul %7, %8, %cst {dimension_numbers = #tpu.dot_dimension_numbers<[1], [0], [0], [1], [0, 0, 1, 1], [], []>} : vector<16x32xf32>, vector<32x128xf32>, vector<16x128xf32> -> vector<16x128xf32>
    %c0_17 = arith.constant 0 : index
    %c0_18 = arith.constant 0 : index
    %10 = vector.load %arg5[%c0_17, %c0_18] : memref<1x128xf32, #tpu.memory_space<vmem>>, vector<1x128xf32>
    %11 = vector.broadcast %10 : vector<1x128xf32> to vector<16x128xf32>
    %12 = arith.addf %9, %11 : vector<16x128xf32>
    %c0_19 = arith.constant 0 : index
    %c0_20 = arith.constant 0 : index
    %13 = vector.load %arg10[%c0_19, %c0_20] : memref<16x65xf32, #tpu.memory_space<vmem>>, vector<16x65xf32>
    %cst_21 = arith.constant dense<0.000000e+00> : vector<2x65xf32>
    %14 = tpu.matmul %1, %13, %cst_21 {dimension_numbers = #tpu.dot_dimension_numbers<[1], [0], [0], [1], [0, 0, 1, 1], [], []>} : vector<2x16xf32>, vector<16x65xf32>, vector<2x65xf32> -> vector<2x65xf32>
    %15 = vector.extract_strided_slice %14 {offsets = [0, 0], sizes = [2, 32], strides = [1, 1]} : vector<2x65xf32> to vector<2x32xf32>
    %16 = vector.extract_strided_slice %14 {offsets = [0, 32], sizes = [2, 32], strides = [1, 1]} : vector<2x65xf32> to vector<2x32xf32>
    %17 = vector.extract_strided_slice %14 {offsets = [0, 64], sizes = [2, 1], strides = [1, 1]} : vector<2x65xf32> to vector<2x1xf32>
    %cst_22 = arith.constant dense<0.000000e+00> : vector<2x32xf32>
    %18 = tpu.matmul %0, %5, %cst_22 {dimension_numbers = #tpu.dot_dimension_numbers<[1], [0], [0], [1], [0, 0, 1, 1], [], []>} : vector<2x8xf32>, vector<8x32xf32>, vector<2x32xf32> -> vector<2x32xf32>
    %19 = arith.addf %18, %15 : vector<2x32xf32>
    %20 = vector.broadcast %6 : vector<1x32xf32> to vector<2x32xf32>
    %21 = arith.addf %19, %20 : vector<2x32xf32>
    %cst_23 = arith.constant 0.000000e+00 : f32
    %22 = vector.broadcast %cst_23 : f32 to vector<2x32xf32>
    %23 = tpu.concatenate %21, %22 in 1 : vector<2x32xf32>, vector<2x32xf32> -> vector<2x64xf32>
    %cst_24 = arith.constant dense<0.000000e+00> : vector<2x128xf32>
    %24 = tpu.matmul %23, %2, %cst_24 {dimension_numbers = #tpu.dot_dimension_numbers<[1], [0], [0], [1], [0, 0, 1, 1], [], []>} : vector<2x64xf32>, vector<64x128xf32>, vector<2x128xf32> -> vector<2x128xf32>
    %25 = vector.extract_strided_slice %12 {offsets = [0, 0], sizes = [2, 128], strides = [1, 1]} : vector<16x128xf32> to vector<2x128xf32>
    %26 = arith.addf %24, %25 : vector<2x128xf32>
    %27 = vector.extract_strided_slice %26 {offsets = [0, 0], sizes = [2, 32], strides = [1, 1]} : vector<2x128xf32> to vector<2x32xf32>
    %28 = arith.negf %27 : vector<2x32xf32>
    %29 = math.exp %28 : vector<2x32xf32>
    %cst_25 = arith.constant 1.000000e+00 : f32
    %30 = vector.broadcast %cst_25 : f32 to vector<2x32xf32>
    %31 = arith.addf %30, %29 : vector<2x32xf32>
    %32 = arith.divf %30, %31 : vector<2x32xf32>
    %33 = vector.extract_strided_slice %26 {offsets = [0, 32], sizes = [2, 32], strides = [1, 1]} : vector<2x128xf32> to vector<2x32xf32>
    %34 = arith.negf %33 : vector<2x32xf32>
    %35 = math.exp %34 : vector<2x32xf32>
    %cst_26 = arith.constant 1.000000e+00 : f32
    %36 = vector.broadcast %cst_26 : f32 to vector<2x32xf32>
    %37 = arith.addf %36, %35 : vector<2x32xf32>
    %38 = arith.divf %36, %37 : vector<2x32xf32>
    %39 = vector.extract_strided_slice %26 {offsets = [0, 64], sizes = [2, 32], strides = [1, 1]} : vector<2x128xf32> to vector<2x32xf32>
    %40 = vector.extract_strided_slice %26 {offsets = [0, 96], sizes = [2, 32], strides = [1, 1]} : vector<2x128xf32> to vector<2x32xf32>
    %41 = arith.mulf %32, %40 : vector<2x32xf32>
    %42 = arith.addf %39, %41 : vector<2x32xf32>
    %43 = math.tanh %42 : vector<2x32xf32>
    %cst_27 = arith.constant 1.000000e+00 : f32
    %44 = vector.broadcast %cst_27 : f32 to vector<2x32xf32>
    %45 = arith.subf %44, %38 : vector<2x32xf32>
    %46 = arith.mulf %45, %43 : vector<2x32xf32>
    %47 = arith.mulf %38, %22 : vector<2x32xf32>
    %48 = arith.addf %46, %47 : vector<2x32xf32>
    %cst_28 = arith.constant dense<0.000000e+00> : vector<2x8xf32>
    %49 = tpu.matmul %48, %3, %cst_28 {dimension_numbers = #tpu.dot_dimension_numbers<[1], [0], [0], [1], [0, 0, 1, 1], [], []>} : vector<2x32xf32>, vector<32x8xf32>, vector<2x8xf32> -> vector<2x8xf32>
    %50 = vector.broadcast %4 : vector<1x8xf32> to vector<2x8xf32>
    %51 = arith.addf %49, %50 : vector<2x8xf32>
    %52 = arith.mulf %51, %0 : vector<2x8xf32>
    %53 = arith.mulf %48, %16 : vector<2x32xf32>
    %cst_29 = arith.constant dense<0.000000e+00> : vector<2xf32>
    %54 = vector.multi_reduction <add>, %53, %cst_29 [1] : vector<2x32xf32> to vector<2xf32>
    %55 = vector.shape_cast %54 : vector<2xf32> to vector<2x1xf32>
    %56 = arith.addf %55, %17 : vector<2x1xf32>
    %cst_30 = arith.constant dense<0xFF800000> : vector<2xf32>
    %57 = vector.multi_reduction <maximumf>, %52, %cst_30 [1] : vector<2x8xf32> to vector<2xf32>
    %58 = vector.shape_cast %57 : vector<2xf32> to vector<2x1xf32>
    %59 = arith.maximumf %58, %56 : vector<2x1xf32>
    %60 = vector.broadcast %59 : vector<2x1xf32> to vector<2x8xf32>
    %61 = arith.subf %52, %60 : vector<2x8xf32>
    %62 = math.exp %61 : vector<2x8xf32>
    %63 = arith.subf %56, %59 : vector<2x1xf32>
    %64 = math.exp %63 : vector<2x1xf32>
    %cst_31 = arith.constant dense<0.000000e+00> : vector<2xf32>
    %65 = vector.multi_reduction <add>, %62, %cst_31 [1] : vector<2x8xf32> to vector<2xf32>
    %66 = vector.shape_cast %65 : vector<2xf32> to vector<2x1xf32>
    %67 = arith.addf %66, %64 : vector<2x1xf32>
    %68 = tpu.reciprocal %67 {approx = true} : vector<2x1xf32> -> vector<2x1xf32>
    %69 = vector.broadcast %68 : vector<2x1xf32> to vector<2x8xf32>
    %70 = arith.mulf %62, %69 : vector<2x8xf32>
    %71 = arith.mulf %70, %0 : vector<2x8xf32>
    %cst_32 = arith.constant dense<0.000000e+00> : vector<2x32xf32>
    %72 = tpu.matmul %71, %5, %cst_32 {dimension_numbers = #tpu.dot_dimension_numbers<[1], [0], [0], [1], [0, 0, 1, 1], [], []>} : vector<2x8xf32>, vector<8x32xf32>, vector<2x32xf32> -> vector<2x32xf32>
    %73 = arith.mulf %64, %68 : vector<2x1xf32>
    %74 = vector.broadcast %73 : vector<2x1xf32> to vector<2x32xf32>
    %75 = arith.mulf %74, %15 : vector<2x32xf32>
    %76 = arith.addf %72, %75 : vector<2x32xf32>
    %77 = vector.broadcast %6 : vector<1x32xf32> to vector<2x32xf32>
    %78 = arith.addf %76, %77 : vector<2x32xf32>
    %79 = tpu.concatenate %78, %48 in 1 : vector<2x32xf32>, vector<2x32xf32> -> vector<2x64xf32>
    %cst_33 = arith.constant dense<0.000000e+00> : vector<2x128xf32>
    %80 = tpu.matmul %79, %2, %cst_33 {dimension_numbers = #tpu.dot_dimension_numbers<[1], [0], [0], [1], [0, 0, 1, 1], [], []>} : vector<2x64xf32>, vector<64x128xf32>, vector<2x128xf32> -> vector<2x128xf32>
    %81 = vector.extract_strided_slice %12 {offsets = [2, 0], sizes = [2, 128], strides = [1, 1]} : vector<16x128xf32> to vector<2x128xf32>
    %82 = arith.addf %80, %81 : vector<2x128xf32>
    %83 = vector.extract_strided_slice %82 {offsets = [0, 0], sizes = [2, 32], strides = [1, 1]} : vector<2x128xf32> to vector<2x32xf32>
    %84 = arith.negf %83 : vector<2x32xf32>
    %85 = math.exp %84 : vector<2x32xf32>
    %cst_34 = arith.constant 1.000000e+00 : f32
    %86 = vector.broadcast %cst_34 : f32 to vector<2x32xf32>
    %87 = arith.addf %86, %85 : vector<2x32xf32>
    %88 = arith.divf %86, %87 : vector<2x32xf32>
    %89 = vector.extract_strided_slice %82 {offsets = [0, 32], sizes = [2, 32], strides = [1, 1]} : vector<2x128xf32> to vector<2x32xf32>
    %90 = arith.negf %89 : vector<2x32xf32>
    %91 = math.exp %90 : vector<2x32xf32>
    %cst_35 = arith.constant 1.000000e+00 : f32
    %92 = vector.broadcast %cst_35 : f32 to vector<2x32xf32>
    %93 = arith.addf %92, %91 : vector<2x32xf32>
    %94 = arith.divf %92, %93 : vector<2x32xf32>
    %95 = vector.extract_strided_slice %82 {offsets = [0, 64], sizes = [2, 32], strides = [1, 1]} : vector<2x128xf32> to vector<2x32xf32>
    %96 = vector.extract_strided_slice %82 {offsets = [0, 96], sizes = [2, 32], strides = [1, 1]} : vector<2x128xf32> to vector<2x32xf32>
    %97 = arith.mulf %88, %96 : vector<2x32xf32>
    %98 = arith.addf %95, %97 : vector<2x32xf32>
    %99 = math.tanh %98 : vector<2x32xf32>
    %cst_36 = arith.constant 1.000000e+00 : f32
    %100 = vector.broadcast %cst_36 : f32 to vector<2x32xf32>
    %101 = arith.subf %100, %94 : vector<2x32xf32>
    %102 = arith.mulf %101, %99 : vector<2x32xf32>
    %103 = arith.mulf %94, %48 : vector<2x32xf32>
    %104 = arith.addf %102, %103 : vector<2x32xf32>
    %cst_37 = arith.constant dense<0.000000e+00> : vector<2x8xf32>
    %105 = tpu.matmul %104, %3, %cst_37 {dimension_numbers = #tpu.dot_dimension_numbers<[1], [0], [0], [1], [0, 0, 1, 1], [], []>} : vector<2x32xf32>, vector<32x8xf32>, vector<2x8xf32> -> vector<2x8xf32>
    %106 = vector.broadcast %4 : vector<1x8xf32> to vector<2x8xf32>
    %107 = arith.addf %105, %106 : vector<2x8xf32>
    %108 = arith.mulf %107, %0 : vector<2x8xf32>
    %109 = arith.mulf %104, %16 : vector<2x32xf32>
    %cst_38 = arith.constant dense<0.000000e+00> : vector<2xf32>
    %110 = vector.multi_reduction <add>, %109, %cst_38 [1] : vector<2x32xf32> to vector<2xf32>
    %111 = vector.shape_cast %110 : vector<2xf32> to vector<2x1xf32>
    %112 = arith.addf %111, %17 : vector<2x1xf32>
    %cst_39 = arith.constant dense<0xFF800000> : vector<2xf32>
    %113 = vector.multi_reduction <maximumf>, %108, %cst_39 [1] : vector<2x8xf32> to vector<2xf32>
    %114 = vector.shape_cast %113 : vector<2xf32> to vector<2x1xf32>
    %115 = arith.maximumf %114, %112 : vector<2x1xf32>
    %116 = vector.broadcast %115 : vector<2x1xf32> to vector<2x8xf32>
    %117 = arith.subf %108, %116 : vector<2x8xf32>
    %118 = math.exp %117 : vector<2x8xf32>
    %119 = arith.subf %112, %115 : vector<2x1xf32>
    %120 = math.exp %119 : vector<2x1xf32>
    %cst_40 = arith.constant dense<0.000000e+00> : vector<2xf32>
    %121 = vector.multi_reduction <add>, %118, %cst_40 [1] : vector<2x8xf32> to vector<2xf32>
    %122 = vector.shape_cast %121 : vector<2xf32> to vector<2x1xf32>
    %123 = arith.addf %122, %120 : vector<2x1xf32>
    %124 = tpu.reciprocal %123 {approx = true} : vector<2x1xf32> -> vector<2x1xf32>
    %125 = vector.broadcast %124 : vector<2x1xf32> to vector<2x8xf32>
    %126 = arith.mulf %118, %125 : vector<2x8xf32>
    %127 = arith.mulf %126, %0 : vector<2x8xf32>
    %cst_41 = arith.constant dense<0.000000e+00> : vector<2x32xf32>
    %128 = tpu.matmul %127, %5, %cst_41 {dimension_numbers = #tpu.dot_dimension_numbers<[1], [0], [0], [1], [0, 0, 1, 1], [], []>} : vector<2x8xf32>, vector<8x32xf32>, vector<2x32xf32> -> vector<2x32xf32>
    %129 = arith.mulf %120, %124 : vector<2x1xf32>
    %130 = vector.broadcast %129 : vector<2x1xf32> to vector<2x32xf32>
    %131 = arith.mulf %130, %15 : vector<2x32xf32>
    %132 = arith.addf %128, %131 : vector<2x32xf32>
    %133 = vector.broadcast %6 : vector<1x32xf32> to vector<2x32xf32>
    %134 = arith.addf %132, %133 : vector<2x32xf32>
    %135 = tpu.concatenate %134, %104 in 1 : vector<2x32xf32>, vector<2x32xf32> -> vector<2x64xf32>
    %cst_42 = arith.constant dense<0.000000e+00> : vector<2x128xf32>
    %136 = tpu.matmul %135, %2, %cst_42 {dimension_numbers = #tpu.dot_dimension_numbers<[1], [0], [0], [1], [0, 0, 1, 1], [], []>} : vector<2x64xf32>, vector<64x128xf32>, vector<2x128xf32> -> vector<2x128xf32>
    %137 = vector.extract_strided_slice %12 {offsets = [4, 0], sizes = [2, 128], strides = [1, 1]} : vector<16x128xf32> to vector<2x128xf32>
    %138 = arith.addf %136, %137 : vector<2x128xf32>
    %139 = vector.extract_strided_slice %138 {offsets = [0, 0], sizes = [2, 32], strides = [1, 1]} : vector<2x128xf32> to vector<2x32xf32>
    %140 = arith.negf %139 : vector<2x32xf32>
    %141 = math.exp %140 : vector<2x32xf32>
    %cst_43 = arith.constant 1.000000e+00 : f32
    %142 = vector.broadcast %cst_43 : f32 to vector<2x32xf32>
    %143 = arith.addf %142, %141 : vector<2x32xf32>
    %144 = arith.divf %142, %143 : vector<2x32xf32>
    %145 = vector.extract_strided_slice %138 {offsets = [0, 32], sizes = [2, 32], strides = [1, 1]} : vector<2x128xf32> to vector<2x32xf32>
    %146 = arith.negf %145 : vector<2x32xf32>
    %147 = math.exp %146 : vector<2x32xf32>
    %cst_44 = arith.constant 1.000000e+00 : f32
    %148 = vector.broadcast %cst_44 : f32 to vector<2x32xf32>
    %149 = arith.addf %148, %147 : vector<2x32xf32>
    %150 = arith.divf %148, %149 : vector<2x32xf32>
    %151 = vector.extract_strided_slice %138 {offsets = [0, 64], sizes = [2, 32], strides = [1, 1]} : vector<2x128xf32> to vector<2x32xf32>
    %152 = vector.extract_strided_slice %138 {offsets = [0, 96], sizes = [2, 32], strides = [1, 1]} : vector<2x128xf32> to vector<2x32xf32>
    %153 = arith.mulf %144, %152 : vector<2x32xf32>
    %154 = arith.addf %151, %153 : vector<2x32xf32>
    %155 = math.tanh %154 : vector<2x32xf32>
    %cst_45 = arith.constant 1.000000e+00 : f32
    %156 = vector.broadcast %cst_45 : f32 to vector<2x32xf32>
    %157 = arith.subf %156, %150 : vector<2x32xf32>
    %158 = arith.mulf %157, %155 : vector<2x32xf32>
    %159 = arith.mulf %150, %104 : vector<2x32xf32>
    %160 = arith.addf %158, %159 : vector<2x32xf32>
    %cst_46 = arith.constant dense<0.000000e+00> : vector<2x8xf32>
    %161 = tpu.matmul %160, %3, %cst_46 {dimension_numbers = #tpu.dot_dimension_numbers<[1], [0], [0], [1], [0, 0, 1, 1], [], []>} : vector<2x32xf32>, vector<32x8xf32>, vector<2x8xf32> -> vector<2x8xf32>
    %162 = vector.broadcast %4 : vector<1x8xf32> to vector<2x8xf32>
    %163 = arith.addf %161, %162 : vector<2x8xf32>
    %164 = arith.mulf %163, %0 : vector<2x8xf32>
    %165 = arith.mulf %160, %16 : vector<2x32xf32>
    %cst_47 = arith.constant dense<0.000000e+00> : vector<2xf32>
    %166 = vector.multi_reduction <add>, %165, %cst_47 [1] : vector<2x32xf32> to vector<2xf32>
    %167 = vector.shape_cast %166 : vector<2xf32> to vector<2x1xf32>
    %168 = arith.addf %167, %17 : vector<2x1xf32>
    %cst_48 = arith.constant dense<0xFF800000> : vector<2xf32>
    %169 = vector.multi_reduction <maximumf>, %164, %cst_48 [1] : vector<2x8xf32> to vector<2xf32>
    %170 = vector.shape_cast %169 : vector<2xf32> to vector<2x1xf32>
    %171 = arith.maximumf %170, %168 : vector<2x1xf32>
    %172 = vector.broadcast %171 : vector<2x1xf32> to vector<2x8xf32>
    %173 = arith.subf %164, %172 : vector<2x8xf32>
    %174 = math.exp %173 : vector<2x8xf32>
    %175 = arith.subf %168, %171 : vector<2x1xf32>
    %176 = math.exp %175 : vector<2x1xf32>
    %cst_49 = arith.constant dense<0.000000e+00> : vector<2xf32>
    %177 = vector.multi_reduction <add>, %174, %cst_49 [1] : vector<2x8xf32> to vector<2xf32>
    %178 = vector.shape_cast %177 : vector<2xf32> to vector<2x1xf32>
    %179 = arith.addf %178, %176 : vector<2x1xf32>
    %180 = tpu.reciprocal %179 {approx = true} : vector<2x1xf32> -> vector<2x1xf32>
    %181 = vector.broadcast %180 : vector<2x1xf32> to vector<2x8xf32>
    %182 = arith.mulf %174, %181 : vector<2x8xf32>
    %183 = arith.mulf %182, %0 : vector<2x8xf32>
    %cst_50 = arith.constant dense<0.000000e+00> : vector<2x32xf32>
    %184 = tpu.matmul %183, %5, %cst_50 {dimension_numbers = #tpu.dot_dimension_numbers<[1], [0], [0], [1], [0, 0, 1, 1], [], []>} : vector<2x8xf32>, vector<8x32xf32>, vector<2x32xf32> -> vector<2x32xf32>
    %185 = arith.mulf %176, %180 : vector<2x1xf32>
    %186 = vector.broadcast %185 : vector<2x1xf32> to vector<2x32xf32>
    %187 = arith.mulf %186, %15 : vector<2x32xf32>
    %188 = arith.addf %184, %187 : vector<2x32xf32>
    %189 = vector.broadcast %6 : vector<1x32xf32> to vector<2x32xf32>
    %190 = arith.addf %188, %189 : vector<2x32xf32>
    %191 = tpu.concatenate %190, %160 in 1 : vector<2x32xf32>, vector<2x32xf32> -> vector<2x64xf32>
    %cst_51 = arith.constant dense<0.000000e+00> : vector<2x128xf32>
    %192 = tpu.matmul %191, %2, %cst_51 {dimension_numbers = #tpu.dot_dimension_numbers<[1], [0], [0], [1], [0, 0, 1, 1], [], []>} : vector<2x64xf32>, vector<64x128xf32>, vector<2x128xf32> -> vector<2x128xf32>
    %193 = vector.extract_strided_slice %12 {offsets = [6, 0], sizes = [2, 128], strides = [1, 1]} : vector<16x128xf32> to vector<2x128xf32>
    %194 = arith.addf %192, %193 : vector<2x128xf32>
    %195 = vector.extract_strided_slice %194 {offsets = [0, 0], sizes = [2, 32], strides = [1, 1]} : vector<2x128xf32> to vector<2x32xf32>
    %196 = arith.negf %195 : vector<2x32xf32>
    %197 = math.exp %196 : vector<2x32xf32>
    %cst_52 = arith.constant 1.000000e+00 : f32
    %198 = vector.broadcast %cst_52 : f32 to vector<2x32xf32>
    %199 = arith.addf %198, %197 : vector<2x32xf32>
    %200 = arith.divf %198, %199 : vector<2x32xf32>
    %201 = vector.extract_strided_slice %194 {offsets = [0, 32], sizes = [2, 32], strides = [1, 1]} : vector<2x128xf32> to vector<2x32xf32>
    %202 = arith.negf %201 : vector<2x32xf32>
    %203 = math.exp %202 : vector<2x32xf32>
    %cst_53 = arith.constant 1.000000e+00 : f32
    %204 = vector.broadcast %cst_53 : f32 to vector<2x32xf32>
    %205 = arith.addf %204, %203 : vector<2x32xf32>
    %206 = arith.divf %204, %205 : vector<2x32xf32>
    %207 = vector.extract_strided_slice %194 {offsets = [0, 64], sizes = [2, 32], strides = [1, 1]} : vector<2x128xf32> to vector<2x32xf32>
    %208 = vector.extract_strided_slice %194 {offsets = [0, 96], sizes = [2, 32], strides = [1, 1]} : vector<2x128xf32> to vector<2x32xf32>
    %209 = arith.mulf %200, %208 : vector<2x32xf32>
    %210 = arith.addf %207, %209 : vector<2x32xf32>
    %211 = math.tanh %210 : vector<2x32xf32>
    %cst_54 = arith.constant 1.000000e+00 : f32
    %212 = vector.broadcast %cst_54 : f32 to vector<2x32xf32>
    %213 = arith.subf %212, %206 : vector<2x32xf32>
    %214 = arith.mulf %213, %211 : vector<2x32xf32>
    %215 = arith.mulf %206, %160 : vector<2x32xf32>
    %216 = arith.addf %214, %215 : vector<2x32xf32>
    %cst_55 = arith.constant dense<0.000000e+00> : vector<2x8xf32>
    %217 = tpu.matmul %216, %3, %cst_55 {dimension_numbers = #tpu.dot_dimension_numbers<[1], [0], [0], [1], [0, 0, 1, 1], [], []>} : vector<2x32xf32>, vector<32x8xf32>, vector<2x8xf32> -> vector<2x8xf32>
    %218 = vector.broadcast %4 : vector<1x8xf32> to vector<2x8xf32>
    %219 = arith.addf %217, %218 : vector<2x8xf32>
    %220 = arith.mulf %219, %0 : vector<2x8xf32>
    %221 = arith.mulf %216, %16 : vector<2x32xf32>
    %cst_56 = arith.constant dense<0.000000e+00> : vector<2xf32>
    %222 = vector.multi_reduction <add>, %221, %cst_56 [1] : vector<2x32xf32> to vector<2xf32>
    %223 = vector.shape_cast %222 : vector<2xf32> to vector<2x1xf32>
    %224 = arith.addf %223, %17 : vector<2x1xf32>
    %cst_57 = arith.constant dense<0xFF800000> : vector<2xf32>
    %225 = vector.multi_reduction <maximumf>, %220, %cst_57 [1] : vector<2x8xf32> to vector<2xf32>
    %226 = vector.shape_cast %225 : vector<2xf32> to vector<2x1xf32>
    %227 = arith.maximumf %226, %224 : vector<2x1xf32>
    %228 = vector.broadcast %227 : vector<2x1xf32> to vector<2x8xf32>
    %229 = arith.subf %220, %228 : vector<2x8xf32>
    %230 = math.exp %229 : vector<2x8xf32>
    %231 = arith.subf %224, %227 : vector<2x1xf32>
    %232 = math.exp %231 : vector<2x1xf32>
    %cst_58 = arith.constant dense<0.000000e+00> : vector<2xf32>
    %233 = vector.multi_reduction <add>, %230, %cst_58 [1] : vector<2x8xf32> to vector<2xf32>
    %234 = vector.shape_cast %233 : vector<2xf32> to vector<2x1xf32>
    %235 = arith.addf %234, %232 : vector<2x1xf32>
    %236 = tpu.reciprocal %235 {approx = true} : vector<2x1xf32> -> vector<2x1xf32>
    %237 = vector.broadcast %236 : vector<2x1xf32> to vector<2x8xf32>
    %238 = arith.mulf %230, %237 : vector<2x8xf32>
    %239 = arith.mulf %238, %0 : vector<2x8xf32>
    %cst_59 = arith.constant dense<0.000000e+00> : vector<2x32xf32>
    %240 = tpu.matmul %239, %5, %cst_59 {dimension_numbers = #tpu.dot_dimension_numbers<[1], [0], [0], [1], [0, 0, 1, 1], [], []>} : vector<2x8xf32>, vector<8x32xf32>, vector<2x32xf32> -> vector<2x32xf32>
    %241 = arith.mulf %232, %236 : vector<2x1xf32>
    %242 = vector.broadcast %241 : vector<2x1xf32> to vector<2x32xf32>
    %243 = arith.mulf %242, %15 : vector<2x32xf32>
    %244 = arith.addf %240, %243 : vector<2x32xf32>
    %245 = vector.broadcast %6 : vector<1x32xf32> to vector<2x32xf32>
    %246 = arith.addf %244, %245 : vector<2x32xf32>
    %247 = tpu.concatenate %246, %216 in 1 : vector<2x32xf32>, vector<2x32xf32> -> vector<2x64xf32>
    %cst_60 = arith.constant dense<0.000000e+00> : vector<2x128xf32>
    %248 = tpu.matmul %247, %2, %cst_60 {dimension_numbers = #tpu.dot_dimension_numbers<[1], [0], [0], [1], [0, 0, 1, 1], [], []>} : vector<2x64xf32>, vector<64x128xf32>, vector<2x128xf32> -> vector<2x128xf32>
    %249 = vector.extract_strided_slice %12 {offsets = [8, 0], sizes = [2, 128], strides = [1, 1]} : vector<16x128xf32> to vector<2x128xf32>
    %250 = arith.addf %248, %249 : vector<2x128xf32>
    %251 = vector.extract_strided_slice %250 {offsets = [0, 0], sizes = [2, 32], strides = [1, 1]} : vector<2x128xf32> to vector<2x32xf32>
    %252 = arith.negf %251 : vector<2x32xf32>
    %253 = math.exp %252 : vector<2x32xf32>
    %cst_61 = arith.constant 1.000000e+00 : f32
    %254 = vector.broadcast %cst_61 : f32 to vector<2x32xf32>
    %255 = arith.addf %254, %253 : vector<2x32xf32>
    %256 = arith.divf %254, %255 : vector<2x32xf32>
    %257 = vector.extract_strided_slice %250 {offsets = [0, 32], sizes = [2, 32], strides = [1, 1]} : vector<2x128xf32> to vector<2x32xf32>
    %258 = arith.negf %257 : vector<2x32xf32>
    %259 = math.exp %258 : vector<2x32xf32>
    %cst_62 = arith.constant 1.000000e+00 : f32
    %260 = vector.broadcast %cst_62 : f32 to vector<2x32xf32>
    %261 = arith.addf %260, %259 : vector<2x32xf32>
    %262 = arith.divf %260, %261 : vector<2x32xf32>
    %263 = vector.extract_strided_slice %250 {offsets = [0, 64], sizes = [2, 32], strides = [1, 1]} : vector<2x128xf32> to vector<2x32xf32>
    %264 = vector.extract_strided_slice %250 {offsets = [0, 96], sizes = [2, 32], strides = [1, 1]} : vector<2x128xf32> to vector<2x32xf32>
    %265 = arith.mulf %256, %264 : vector<2x32xf32>
    %266 = arith.addf %263, %265 : vector<2x32xf32>
    %267 = math.tanh %266 : vector<2x32xf32>
    %cst_63 = arith.constant 1.000000e+00 : f32
    %268 = vector.broadcast %cst_63 : f32 to vector<2x32xf32>
    %269 = arith.subf %268, %262 : vector<2x32xf32>
    %270 = arith.mulf %269, %267 : vector<2x32xf32>
    %271 = arith.mulf %262, %216 : vector<2x32xf32>
    %272 = arith.addf %270, %271 : vector<2x32xf32>
    %cst_64 = arith.constant dense<0.000000e+00> : vector<2x8xf32>
    %273 = tpu.matmul %272, %3, %cst_64 {dimension_numbers = #tpu.dot_dimension_numbers<[1], [0], [0], [1], [0, 0, 1, 1], [], []>} : vector<2x32xf32>, vector<32x8xf32>, vector<2x8xf32> -> vector<2x8xf32>
    %274 = vector.broadcast %4 : vector<1x8xf32> to vector<2x8xf32>
    %275 = arith.addf %273, %274 : vector<2x8xf32>
    %276 = arith.mulf %275, %0 : vector<2x8xf32>
    %277 = arith.mulf %272, %16 : vector<2x32xf32>
    %cst_65 = arith.constant dense<0.000000e+00> : vector<2xf32>
    %278 = vector.multi_reduction <add>, %277, %cst_65 [1] : vector<2x32xf32> to vector<2xf32>
    %279 = vector.shape_cast %278 : vector<2xf32> to vector<2x1xf32>
    %280 = arith.addf %279, %17 : vector<2x1xf32>
    %cst_66 = arith.constant dense<0xFF800000> : vector<2xf32>
    %281 = vector.multi_reduction <maximumf>, %276, %cst_66 [1] : vector<2x8xf32> to vector<2xf32>
    %282 = vector.shape_cast %281 : vector<2xf32> to vector<2x1xf32>
    %283 = arith.maximumf %282, %280 : vector<2x1xf32>
    %284 = vector.broadcast %283 : vector<2x1xf32> to vector<2x8xf32>
    %285 = arith.subf %276, %284 : vector<2x8xf32>
    %286 = math.exp %285 : vector<2x8xf32>
    %287 = arith.subf %280, %283 : vector<2x1xf32>
    %288 = math.exp %287 : vector<2x1xf32>
    %cst_67 = arith.constant dense<0.000000e+00> : vector<2xf32>
    %289 = vector.multi_reduction <add>, %286, %cst_67 [1] : vector<2x8xf32> to vector<2xf32>
    %290 = vector.shape_cast %289 : vector<2xf32> to vector<2x1xf32>
    %291 = arith.addf %290, %288 : vector<2x1xf32>
    %292 = tpu.reciprocal %291 {approx = true} : vector<2x1xf32> -> vector<2x1xf32>
    %293 = vector.broadcast %292 : vector<2x1xf32> to vector<2x8xf32>
    %294 = arith.mulf %286, %293 : vector<2x8xf32>
    %295 = arith.mulf %294, %0 : vector<2x8xf32>
    %cst_68 = arith.constant dense<0.000000e+00> : vector<2x32xf32>
    %296 = tpu.matmul %295, %5, %cst_68 {dimension_numbers = #tpu.dot_dimension_numbers<[1], [0], [0], [1], [0, 0, 1, 1], [], []>} : vector<2x8xf32>, vector<8x32xf32>, vector<2x32xf32> -> vector<2x32xf32>
    %297 = arith.mulf %288, %292 : vector<2x1xf32>
    %298 = vector.broadcast %297 : vector<2x1xf32> to vector<2x32xf32>
    %299 = arith.mulf %298, %15 : vector<2x32xf32>
    %300 = arith.addf %296, %299 : vector<2x32xf32>
    %301 = vector.broadcast %6 : vector<1x32xf32> to vector<2x32xf32>
    %302 = arith.addf %300, %301 : vector<2x32xf32>
    %303 = tpu.concatenate %302, %272 in 1 : vector<2x32xf32>, vector<2x32xf32> -> vector<2x64xf32>
    %cst_69 = arith.constant dense<0.000000e+00> : vector<2x128xf32>
    %304 = tpu.matmul %303, %2, %cst_69 {dimension_numbers = #tpu.dot_dimension_numbers<[1], [0], [0], [1], [0, 0, 1, 1], [], []>} : vector<2x64xf32>, vector<64x128xf32>, vector<2x128xf32> -> vector<2x128xf32>
    %305 = vector.extract_strided_slice %12 {offsets = [10, 0], sizes = [2, 128], strides = [1, 1]} : vector<16x128xf32> to vector<2x128xf32>
    %306 = arith.addf %304, %305 : vector<2x128xf32>
    %307 = vector.extract_strided_slice %306 {offsets = [0, 0], sizes = [2, 32], strides = [1, 1]} : vector<2x128xf32> to vector<2x32xf32>
    %308 = arith.negf %307 : vector<2x32xf32>
    %309 = math.exp %308 : vector<2x32xf32>
    %cst_70 = arith.constant 1.000000e+00 : f32
    %310 = vector.broadcast %cst_70 : f32 to vector<2x32xf32>
    %311 = arith.addf %310, %309 : vector<2x32xf32>
    %312 = arith.divf %310, %311 : vector<2x32xf32>
    %313 = vector.extract_strided_slice %306 {offsets = [0, 32], sizes = [2, 32], strides = [1, 1]} : vector<2x128xf32> to vector<2x32xf32>
    %314 = arith.negf %313 : vector<2x32xf32>
    %315 = math.exp %314 : vector<2x32xf32>
    %cst_71 = arith.constant 1.000000e+00 : f32
    %316 = vector.broadcast %cst_71 : f32 to vector<2x32xf32>
    %317 = arith.addf %316, %315 : vector<2x32xf32>
    %318 = arith.divf %316, %317 : vector<2x32xf32>
    %319 = vector.extract_strided_slice %306 {offsets = [0, 64], sizes = [2, 32], strides = [1, 1]} : vector<2x128xf32> to vector<2x32xf32>
    %320 = vector.extract_strided_slice %306 {offsets = [0, 96], sizes = [2, 32], strides = [1, 1]} : vector<2x128xf32> to vector<2x32xf32>
    %321 = arith.mulf %312, %320 : vector<2x32xf32>
    %322 = arith.addf %319, %321 : vector<2x32xf32>
    %323 = math.tanh %322 : vector<2x32xf32>
    %cst_72 = arith.constant 1.000000e+00 : f32
    %324 = vector.broadcast %cst_72 : f32 to vector<2x32xf32>
    %325 = arith.subf %324, %318 : vector<2x32xf32>
    %326 = arith.mulf %325, %323 : vector<2x32xf32>
    %327 = arith.mulf %318, %272 : vector<2x32xf32>
    %328 = arith.addf %326, %327 : vector<2x32xf32>
    %cst_73 = arith.constant dense<0.000000e+00> : vector<2x8xf32>
    %329 = tpu.matmul %328, %3, %cst_73 {dimension_numbers = #tpu.dot_dimension_numbers<[1], [0], [0], [1], [0, 0, 1, 1], [], []>} : vector<2x32xf32>, vector<32x8xf32>, vector<2x8xf32> -> vector<2x8xf32>
    %330 = vector.broadcast %4 : vector<1x8xf32> to vector<2x8xf32>
    %331 = arith.addf %329, %330 : vector<2x8xf32>
    %332 = arith.mulf %331, %0 : vector<2x8xf32>
    %333 = arith.mulf %328, %16 : vector<2x32xf32>
    %cst_74 = arith.constant dense<0.000000e+00> : vector<2xf32>
    %334 = vector.multi_reduction <add>, %333, %cst_74 [1] : vector<2x32xf32> to vector<2xf32>
    %335 = vector.shape_cast %334 : vector<2xf32> to vector<2x1xf32>
    %336 = arith.addf %335, %17 : vector<2x1xf32>
    %cst_75 = arith.constant dense<0xFF800000> : vector<2xf32>
    %337 = vector.multi_reduction <maximumf>, %332, %cst_75 [1] : vector<2x8xf32> to vector<2xf32>
    %338 = vector.shape_cast %337 : vector<2xf32> to vector<2x1xf32>
    %339 = arith.maximumf %338, %336 : vector<2x1xf32>
    %340 = vector.broadcast %339 : vector<2x1xf32> to vector<2x8xf32>
    %341 = arith.subf %332, %340 : vector<2x8xf32>
    %342 = math.exp %341 : vector<2x8xf32>
    %343 = arith.subf %336, %339 : vector<2x1xf32>
    %344 = math.exp %343 : vector<2x1xf32>
    %cst_76 = arith.constant dense<0.000000e+00> : vector<2xf32>
    %345 = vector.multi_reduction <add>, %342, %cst_76 [1] : vector<2x8xf32> to vector<2xf32>
    %346 = vector.shape_cast %345 : vector<2xf32> to vector<2x1xf32>
    %347 = arith.addf %346, %344 : vector<2x1xf32>
    %348 = tpu.reciprocal %347 {approx = true} : vector<2x1xf32> -> vector<2x1xf32>
    %349 = vector.broadcast %348 : vector<2x1xf32> to vector<2x8xf32>
    %350 = arith.mulf %342, %349 : vector<2x8xf32>
    %351 = arith.mulf %350, %0 : vector<2x8xf32>
    %cst_77 = arith.constant dense<0.000000e+00> : vector<2x32xf32>
    %352 = tpu.matmul %351, %5, %cst_77 {dimension_numbers = #tpu.dot_dimension_numbers<[1], [0], [0], [1], [0, 0, 1, 1], [], []>} : vector<2x8xf32>, vector<8x32xf32>, vector<2x32xf32> -> vector<2x32xf32>
    %353 = arith.mulf %344, %348 : vector<2x1xf32>
    %354 = vector.broadcast %353 : vector<2x1xf32> to vector<2x32xf32>
    %355 = arith.mulf %354, %15 : vector<2x32xf32>
    %356 = arith.addf %352, %355 : vector<2x32xf32>
    %357 = vector.broadcast %6 : vector<1x32xf32> to vector<2x32xf32>
    %358 = arith.addf %356, %357 : vector<2x32xf32>
    %359 = tpu.concatenate %358, %328 in 1 : vector<2x32xf32>, vector<2x32xf32> -> vector<2x64xf32>
    %cst_78 = arith.constant dense<0.000000e+00> : vector<2x128xf32>
    %360 = tpu.matmul %359, %2, %cst_78 {dimension_numbers = #tpu.dot_dimension_numbers<[1], [0], [0], [1], [0, 0, 1, 1], [], []>} : vector<2x64xf32>, vector<64x128xf32>, vector<2x128xf32> -> vector<2x128xf32>
    %361 = vector.extract_strided_slice %12 {offsets = [12, 0], sizes = [2, 128], strides = [1, 1]} : vector<16x128xf32> to vector<2x128xf32>
    %362 = arith.addf %360, %361 : vector<2x128xf32>
    %363 = vector.extract_strided_slice %362 {offsets = [0, 0], sizes = [2, 32], strides = [1, 1]} : vector<2x128xf32> to vector<2x32xf32>
    %364 = arith.negf %363 : vector<2x32xf32>
    %365 = math.exp %364 : vector<2x32xf32>
    %cst_79 = arith.constant 1.000000e+00 : f32
    %366 = vector.broadcast %cst_79 : f32 to vector<2x32xf32>
    %367 = arith.addf %366, %365 : vector<2x32xf32>
    %368 = arith.divf %366, %367 : vector<2x32xf32>
    %369 = vector.extract_strided_slice %362 {offsets = [0, 32], sizes = [2, 32], strides = [1, 1]} : vector<2x128xf32> to vector<2x32xf32>
    %370 = arith.negf %369 : vector<2x32xf32>
    %371 = math.exp %370 : vector<2x32xf32>
    %cst_80 = arith.constant 1.000000e+00 : f32
    %372 = vector.broadcast %cst_80 : f32 to vector<2x32xf32>
    %373 = arith.addf %372, %371 : vector<2x32xf32>
    %374 = arith.divf %372, %373 : vector<2x32xf32>
    %375 = vector.extract_strided_slice %362 {offsets = [0, 64], sizes = [2, 32], strides = [1, 1]} : vector<2x128xf32> to vector<2x32xf32>
    %376 = vector.extract_strided_slice %362 {offsets = [0, 96], sizes = [2, 32], strides = [1, 1]} : vector<2x128xf32> to vector<2x32xf32>
    %377 = arith.mulf %368, %376 : vector<2x32xf32>
    %378 = arith.addf %375, %377 : vector<2x32xf32>
    %379 = math.tanh %378 : vector<2x32xf32>
    %cst_81 = arith.constant 1.000000e+00 : f32
    %380 = vector.broadcast %cst_81 : f32 to vector<2x32xf32>
    %381 = arith.subf %380, %374 : vector<2x32xf32>
    %382 = arith.mulf %381, %379 : vector<2x32xf32>
    %383 = arith.mulf %374, %328 : vector<2x32xf32>
    %384 = arith.addf %382, %383 : vector<2x32xf32>
    %cst_82 = arith.constant dense<0.000000e+00> : vector<2x8xf32>
    %385 = tpu.matmul %384, %3, %cst_82 {dimension_numbers = #tpu.dot_dimension_numbers<[1], [0], [0], [1], [0, 0, 1, 1], [], []>} : vector<2x32xf32>, vector<32x8xf32>, vector<2x8xf32> -> vector<2x8xf32>
    %386 = vector.broadcast %4 : vector<1x8xf32> to vector<2x8xf32>
    %387 = arith.addf %385, %386 : vector<2x8xf32>
    %388 = arith.mulf %387, %0 : vector<2x8xf32>
    %389 = arith.mulf %384, %16 : vector<2x32xf32>
    %cst_83 = arith.constant dense<0.000000e+00> : vector<2xf32>
    %390 = vector.multi_reduction <add>, %389, %cst_83 [1] : vector<2x32xf32> to vector<2xf32>
    %391 = vector.shape_cast %390 : vector<2xf32> to vector<2x1xf32>
    %392 = arith.addf %391, %17 : vector<2x1xf32>
    %cst_84 = arith.constant dense<0xFF800000> : vector<2xf32>
    %393 = vector.multi_reduction <maximumf>, %388, %cst_84 [1] : vector<2x8xf32> to vector<2xf32>
    %394 = vector.shape_cast %393 : vector<2xf32> to vector<2x1xf32>
    %395 = arith.maximumf %394, %392 : vector<2x1xf32>
    %396 = vector.broadcast %395 : vector<2x1xf32> to vector<2x8xf32>
    %397 = arith.subf %388, %396 : vector<2x8xf32>
    %398 = math.exp %397 : vector<2x8xf32>
    %399 = arith.subf %392, %395 : vector<2x1xf32>
    %400 = math.exp %399 : vector<2x1xf32>
    %cst_85 = arith.constant dense<0.000000e+00> : vector<2xf32>
    %401 = vector.multi_reduction <add>, %398, %cst_85 [1] : vector<2x8xf32> to vector<2xf32>
    %402 = vector.shape_cast %401 : vector<2xf32> to vector<2x1xf32>
    %403 = arith.addf %402, %400 : vector<2x1xf32>
    %404 = tpu.reciprocal %403 {approx = true} : vector<2x1xf32> -> vector<2x1xf32>
    %405 = vector.broadcast %404 : vector<2x1xf32> to vector<2x8xf32>
    %406 = arith.mulf %398, %405 : vector<2x8xf32>
    %407 = arith.mulf %406, %0 : vector<2x8xf32>
    %cst_86 = arith.constant dense<0.000000e+00> : vector<2x32xf32>
    %408 = tpu.matmul %407, %5, %cst_86 {dimension_numbers = #tpu.dot_dimension_numbers<[1], [0], [0], [1], [0, 0, 1, 1], [], []>} : vector<2x8xf32>, vector<8x32xf32>, vector<2x32xf32> -> vector<2x32xf32>
    %409 = arith.mulf %400, %404 : vector<2x1xf32>
    %410 = vector.broadcast %409 : vector<2x1xf32> to vector<2x32xf32>
    %411 = arith.mulf %410, %15 : vector<2x32xf32>
    %412 = arith.addf %408, %411 : vector<2x32xf32>
    %413 = vector.broadcast %6 : vector<1x32xf32> to vector<2x32xf32>
    %414 = arith.addf %412, %413 : vector<2x32xf32>
    %415 = tpu.concatenate %414, %384 in 1 : vector<2x32xf32>, vector<2x32xf32> -> vector<2x64xf32>
    %cst_87 = arith.constant dense<0.000000e+00> : vector<2x128xf32>
    %416 = tpu.matmul %415, %2, %cst_87 {dimension_numbers = #tpu.dot_dimension_numbers<[1], [0], [0], [1], [0, 0, 1, 1], [], []>} : vector<2x64xf32>, vector<64x128xf32>, vector<2x128xf32> -> vector<2x128xf32>
    %417 = vector.extract_strided_slice %12 {offsets = [14, 0], sizes = [2, 128], strides = [1, 1]} : vector<16x128xf32> to vector<2x128xf32>
    %418 = arith.addf %416, %417 : vector<2x128xf32>
    %419 = vector.extract_strided_slice %418 {offsets = [0, 0], sizes = [2, 32], strides = [1, 1]} : vector<2x128xf32> to vector<2x32xf32>
    %420 = arith.negf %419 : vector<2x32xf32>
    %421 = math.exp %420 : vector<2x32xf32>
    %cst_88 = arith.constant 1.000000e+00 : f32
    %422 = vector.broadcast %cst_88 : f32 to vector<2x32xf32>
    %423 = arith.addf %422, %421 : vector<2x32xf32>
    %424 = arith.divf %422, %423 : vector<2x32xf32>
    %425 = vector.extract_strided_slice %418 {offsets = [0, 32], sizes = [2, 32], strides = [1, 1]} : vector<2x128xf32> to vector<2x32xf32>
    %426 = arith.negf %425 : vector<2x32xf32>
    %427 = math.exp %426 : vector<2x32xf32>
    %cst_89 = arith.constant 1.000000e+00 : f32
    %428 = vector.broadcast %cst_89 : f32 to vector<2x32xf32>
    %429 = arith.addf %428, %427 : vector<2x32xf32>
    %430 = arith.divf %428, %429 : vector<2x32xf32>
    %431 = vector.extract_strided_slice %418 {offsets = [0, 64], sizes = [2, 32], strides = [1, 1]} : vector<2x128xf32> to vector<2x32xf32>
    %432 = vector.extract_strided_slice %418 {offsets = [0, 96], sizes = [2, 32], strides = [1, 1]} : vector<2x128xf32> to vector<2x32xf32>
    %433 = arith.mulf %424, %432 : vector<2x32xf32>
    %434 = arith.addf %431, %433 : vector<2x32xf32>
    %435 = math.tanh %434 : vector<2x32xf32>
    %cst_90 = arith.constant 1.000000e+00 : f32
    %436 = vector.broadcast %cst_90 : f32 to vector<2x32xf32>
    %437 = arith.subf %436, %430 : vector<2x32xf32>
    %438 = arith.mulf %437, %435 : vector<2x32xf32>
    %439 = arith.mulf %430, %384 : vector<2x32xf32>
    %440 = arith.addf %438, %439 : vector<2x32xf32>
    %441 = vector.extract_strided_slice %48 {offsets = [0, 0], sizes = [1, 32], strides = [1, 1]} : vector<2x32xf32> to vector<1x32xf32>
    %442 = vector.extract_strided_slice %104 {offsets = [0, 0], sizes = [1, 32], strides = [1, 1]} : vector<2x32xf32> to vector<1x32xf32>
    %443 = vector.extract_strided_slice %160 {offsets = [0, 0], sizes = [1, 32], strides = [1, 1]} : vector<2x32xf32> to vector<1x32xf32>
    %444 = vector.extract_strided_slice %216 {offsets = [0, 0], sizes = [1, 32], strides = [1, 1]} : vector<2x32xf32> to vector<1x32xf32>
    %445 = vector.extract_strided_slice %272 {offsets = [0, 0], sizes = [1, 32], strides = [1, 1]} : vector<2x32xf32> to vector<1x32xf32>
    %446 = vector.extract_strided_slice %328 {offsets = [0, 0], sizes = [1, 32], strides = [1, 1]} : vector<2x32xf32> to vector<1x32xf32>
    %447 = vector.extract_strided_slice %384 {offsets = [0, 0], sizes = [1, 32], strides = [1, 1]} : vector<2x32xf32> to vector<1x32xf32>
    %448 = vector.extract_strided_slice %440 {offsets = [0, 0], sizes = [1, 32], strides = [1, 1]} : vector<2x32xf32> to vector<1x32xf32>
    %449 = vector.extract_strided_slice %48 {offsets = [1, 0], sizes = [1, 32], strides = [1, 1]} : vector<2x32xf32> to vector<1x32xf32>
    %450 = vector.extract_strided_slice %104 {offsets = [1, 0], sizes = [1, 32], strides = [1, 1]} : vector<2x32xf32> to vector<1x32xf32>
    %451 = vector.extract_strided_slice %160 {offsets = [1, 0], sizes = [1, 32], strides = [1, 1]} : vector<2x32xf32> to vector<1x32xf32>
    %452 = vector.extract_strided_slice %216 {offsets = [1, 0], sizes = [1, 32], strides = [1, 1]} : vector<2x32xf32> to vector<1x32xf32>
    %453 = vector.extract_strided_slice %272 {offsets = [1, 0], sizes = [1, 32], strides = [1, 1]} : vector<2x32xf32> to vector<1x32xf32>
    %454 = vector.extract_strided_slice %328 {offsets = [1, 0], sizes = [1, 32], strides = [1, 1]} : vector<2x32xf32> to vector<1x32xf32>
    %455 = vector.extract_strided_slice %384 {offsets = [1, 0], sizes = [1, 32], strides = [1, 1]} : vector<2x32xf32> to vector<1x32xf32>
    %456 = vector.extract_strided_slice %440 {offsets = [1, 0], sizes = [1, 32], strides = [1, 1]} : vector<2x32xf32> to vector<1x32xf32>
    %457 = tpu.concatenate %441, %442, %443, %444, %445, %446, %447, %448, %449, %450, %451, %452, %453, %454, %455, %456 in 0 : vector<1x32xf32>, vector<1x32xf32>, vector<1x32xf32>, vector<1x32xf32>, vector<1x32xf32>, vector<1x32xf32>, vector<1x32xf32>, vector<1x32xf32>, vector<1x32xf32>, vector<1x32xf32>, vector<1x32xf32>, vector<1x32xf32>, vector<1x32xf32>, vector<1x32xf32>, vector<1x32xf32>, vector<1x32xf32> -> vector<16x32xf32>
    %c0_91 = arith.constant 0 : index
    %c0_92 = arith.constant 0 : index
    %458 = vector.load %arg11[%c0_91, %c0_92] : memref<32x128xf32, #tpu.memory_space<vmem>>, vector<32x128xf32>
    %cst_93 = arith.constant dense<0.000000e+00> : vector<16x128xf32>
    %459 = tpu.matmul %457, %458, %cst_93 {dimension_numbers = #tpu.dot_dimension_numbers<[1], [0], [0], [1], [0, 0, 1, 1], [], []>} : vector<16x32xf32>, vector<32x128xf32>, vector<16x128xf32> -> vector<16x128xf32>
    %c0_94 = arith.constant 0 : index
    %c0_95 = arith.constant 0 : index
    %460 = vector.load %arg12[%c0_94, %c0_95] : memref<1x128xf32, #tpu.memory_space<vmem>>, vector<1x128xf32>
    %461 = vector.broadcast %460 : vector<1x128xf32> to vector<16x128xf32>
    %462 = arith.addf %459, %461 : vector<16x128xf32>
    %c0_96 = arith.constant 0 : index
    %c0_97 = arith.constant 0 : index
    %463 = vector.load %arg13[%c0_96, %c0_97] : memref<16x128xf32, #tpu.memory_space<vmem>>, vector<16x128xf32>
    tpu.vector_store %arg13[%c0_96, %c0_97], %462 {strides = array<i32>} : memref<16x128xf32, #tpu.memory_space<vmem>>, vector<16x128xf32>,
    return
  }
}

</mosaic_0001>

<bundles_post_ra>
// kernel: gen_network_forward.1
= control target key start
LH: loop header
LB: loop body
LE: loop exit
PB: predicated region body
PF: predicated region fallthrough
CT: control target
= control target key end

     0   :  { %v3407_v2 = vmov 0.0|0.0   ;;  %vm3408_vm0 = vmmov 0   ;;  %v3409_v4 = vmov 0.0   ;;  %vm75_vm1 = vcmask 261120   ;;  %s4008_s0 = inlined_call_operand.vmem [shape: f32[16,32], index: 0, kind: input, shape index: {}]   ;;  %s4009_s1 = inlined_call_operand.vmem [shape: f32[2,8], index: 1, kind: input, shape index: {}]   ;;  %s4010_s2 = inlined_call_operand.vmem [shape: f32[2,16], index: 2, kind: input, shape index: {}]   ;;  %s4011_s3 = inlined_call_operand.vmem [shape: f32[64,128], index: 3, kind: input, shape index: {}]   ;;  %s4012_s4 = inlined_call_operand.vmem [shape: f32[32,128], index: 4, kind: input, shape index: {}]   ;;  %s4013_s5 = inlined_call_operand.vmem [shape: f32[1,128], index: 5, kind: input, shape index: {}]   ;;  %s4014_s6 = inlined_call_operand.vmem [shape: f32[32,8], index: 6, kind: input, shape index: {}]   ;;  %s4015_s7 = inlined_call_operand.vmem [shape: f32[1,8], index: 7, kind: input, shape index: {}]   ;;  %s4016_s8 = inlined_call_operand.vmem [shape: f32[8,32], index: 8, kind: input, shape index: {}]   ;;  %s4017_s9 = inlined_call_operand.vmem [shape: f32[1,32], index: 9, kind: input, shape index: {}]   ;;  %s4018_s10 = inlined_call_operand.vmem [shape: f32[16,65], index: 10, kind: input, shape index: {}]   ;;  %s4019_s11 = inlined_call_operand.vmem [shape: f32[32,128], index: 11, kind: input, shape index: {}]   ;;  %s4020_s12 = inlined_call_operand.vmem [shape: f32[1,128], index: 12, kind: input, shape index: {}]   ;;  %s4021_s13 = inlined_call_operand.hbm [shape: f32[16,128], index: 13, kind: output, shape index: {}]  }
   0x1   :  { %v157_v0 = vld [vmem:[%s4018_s10] sm:$0xff]  ;;  %v158_v1 = vld [vmem:[%s4018_s10 + $0x8] sm:$0xff]  ;;  %3128 = vmatprep.subr.bf16.mxu1 %v3407_v2  ;;  %2837 = vmatprep.mubr.msk.f32.mxu1 %vm3408_vm0, %v3409_v4  ;;  %v66_v7 = vld [vmem:[%s4012_s4 + $0x10] sm:$0xff]  ;;  %vm159_vm2 = vcmask 130048  }
   0x2   :  { %v3129_v3 = vpack.c.bf16 %v158_v1, %v157_v0  ;;  %v64_v5 = vld [vmem:[%s4012_s4] sm:$0xff]  ;;  %v65_v6 = vld [vmem:[%s4012_s4 + $0x8] sm:$0xff]  ;;  %v67_v10 = vld [vmem:[%s4012_s4 + $0x18] sm:$0xff] }
   0x3   :  { %v46_v8 = vld [vmem:[%s4010_s2] sm:$0x3]  ;;  %v3120_v9 = vpack.c.bf16 %v65_v6, %v64_v5  ;;  %v3124_v13 = vpack.c.bf16 %v67_v10, %v66_v7 }
   0x4   :  { %3130 = vmatpush3.bf16.msra.mxu1 %v3129_v3  ;;  %v62_v11 = vld [vmem:[%s4008_s0] sm:$0xff] }
   0x5   :  { %2840 = vmatprep.subr.mxu1 %v3409_v4  ;;  %v3518_v12 = vld [vmem:[%s4016_s8] sm:$0xff]  ;;  %2830 = vmatprep.mubr.msk.f32.mxu0 %vm75_vm1, %v62_v11 }
   0x6   :  { %3121 = vmatprep.subr.bf16.mxu0 %v3120_v9 }
   0x7   :  { %18 = vsyncpa [#allocation3], 0  ;;  %2838 = vmatmul.mubr.msk.f32.vlgmr.msra.gmra.mrb[0].mxu1 %vm159_vm2, %v46_v8  ;;  %3123 = vmatpush3.bf16.msra.mxu0 %v3120_v9  ;;  %v3527_v14 = vld [vmem:[%s4009_s1] sm:$0x3]  ;;  %vm233_vm3 = vcmask 64512   ;;  %v48_v16 = vld [vmem:[%s4011_s3 + $0x8] sm:$0xff] }
   0x8   :  { %2841 = vmatpush3.msra.mxu1 %v3518_v12  ;;  %2842 = vmatprep.mubr.msk.f32.mxu1 %vm3408_vm0, %v3409_v4  ;;  %v47_v15 = vld [vmem:[%s4011_s3] sm:$0xff]  ;;  %v63_v17 = vld [vmem:[%s4008_s0 + $0x8] sm:$0xff]  ;;  %v49_v19 = vld [vmem:[%s4011_s3 + $0x10] sm:$0xff]  ;;  %vm315_vm4 = vcmask 523264   ;;  %s3411_s25 = smov 64   ;;  %s3412_s17 = smov 96  }
   0x9   :  { %3125 = vmatprep.subr.bf16.mxu0 %v3124_v13  ;;  %3143 = vmatprep.subr.bf16.mxu1 %v3407_v2  ;;  %v3541_v18 = vpack.c.bf16 %v48_v16, %v47_v15  ;;  %v50_v20 = vld [vmem:[%s4011_s3 + $0x18] sm:$0xff]  ;;  %v51_v22 = vld [vmem:[%s4011_s3 + $0x20] sm:$0xff]  ;;  %v52_v23 = vld [vmem:[%s4011_s3 + $0x28] sm:$0xff]  ;;  %vm501_vm5 = vcmask 254976   ;;  %vm506_vm6 = vcmask 58368   ;;  %vm2509_vm7 = vcmask 1040384  }
   0xa   :  { %v3554_v21 = vpack.c.bf16 %v50_v20, %v49_v19  ;;  %v3567_v24 = vpack.c.bf16 %v52_v23, %v51_v22  ;;  %v53_v25 = vld [vmem:[%s4011_s3 + $0x30] sm:$0xff]  ;;  %v54_v26 = vld [vmem:[%s4011_s3 + $0x38] sm:$0xff]  ;;  %v3586_v30 = vld [vmem:[%s4017_s9] ss:$0 sm:$0xff]  ;;  %vm2511_vm8 = vcmask 1041408   ;;  %vm2513_vm9 = vcmask 1042432  }
   0xb   :  { %2843 = vmatmul.mubr.msk.f32.vlgmr.msra.gmra.mrb[2].mxu1 %vm233_vm3, %v3527_v14  ;;  %3127 = vmatpush3.bf16.msra.mxu0 %v3124_v13  ;;  %v3577_v27 = vpack.c.bf16 %v54_v26, %v53_v25  ;;  %v2644_v34 = vld [vmem:[%s4013_s5] ss:$0 sm:$0xff]  ;;  %s3410_s5 = smov 32   ;;  %v56_v53 = vld [vmem:[%s4014_s6 + $0x8] sm:$0xff]  ;;  %v57_v54 = vld [vmem:[%s4014_s6 + $0x10] sm:$0xff]  ;;  %v3413_v13 = vmov 64  }
   0xc   :  { %3131 = vmatprep.subr.bf16.mxu0 %v3407_v2  ;;  %2872 = vmatprep.mubr.msk.f32.mxu1 %vm3408_vm0, %v3409_v4  ;;  %v55_v52 = vld [vmem:[%s4014_s6] sm:$0xff]  ;;  %v58_v56 = vld [vmem:[%s4014_s6 + $0x18] sm:$0xff]  ;;  %vm2515_vm10 = vcmask 1043456   ;;  %vm2517_vm11 = vcmask 1044480   ;;  %vm2519_vm12 = vcmask 1045504   ;;  %vm2521_vm13 = vcmask 1046528  }
   0xd   :  { %v3613_v55 = vpack.c.bf16 %v56_v53, %v55_v52  ;;  %v3619_v57 = vpack.c.bf16 %v58_v56, %v57_v54  ;;  %v3645_v6 = vld [vmem:[%s4015_s7] ss:$0 sm:$0xff]  ;;  %3287 = vset.pattern.permute.xlu0 %v3413_v13  ;;  %3288 = vset.pattern.permute.xlu1 %v3413_v13  ;;  %s3414_s26 = smov [#allocation2]  }
   0xe   :  { %2831 = vmatmul.mubr.msk.f32.vlgmr.msra.gmra.mrb[0].mxu0 %vm75_vm1, %v63_v17  ;;  %s2633_s27 = sshll.u32 %s3414_s26, 4  ;;  %s2634_s27 = int_to_ptr.vmem [resolvable:$true] %s2633_s27 }
   0xf   :  { %3133 = vmatpush3.bf16.msra.mxu0 %v3541_v18  ;;  %2861 = vmatprep.mubr.msk.f32.mxu0 %vm3408_vm0, %v3409_v4  ;;  %s3383_s28 = scalar_lea.vmem %s2634_s27, 256  ;;  %p3388_p1 = scmp.lt.s32.totalorder %s2634_s27, %s2634_s27 }
  0x10   :  { %3134 = vmatprep.subr.bf16.mxu0 %v3407_v2  ;;  %3145 = vmatpush3.bf16.msra.mxu1 %v3613_v55  ;;  %p3384_p0 = scmp.ne.s32.totalorder %s2634_s27, %s3383_s28  ;;  %p3389_p2 = scmp.lt.s32.totalorder %s3383_s28, %s3383_s28 }
  0x11   :  { %3146 = vmatprep.subr.bf16.mxu1 %v3407_v2 }
  0x12   :  { %p3390_p3 = por %p3389_p2, %p3388_p1 }
  0x13   :  { %3136 = vmatpush3.bf16.msra.mxu0 %v3554_v21 }
  0x14   :  { %3137 = vmatprep.subr.bf16.mxu0 %v3407_v2  ;;  %3148 = vmatpush3.bf16.msra.mxu1 %v3619_v57  ;;  %p3391_p4 = pnand %p3390_p3, %p3384_p0 }
  0x15   :  { %2875 = vmatprep.subr.mxu1 %v3409_v4 }
  0x17   :  { %3139 = vmatpush3.bf16.msra.mxu0 %v3567_v24 }
  0x18   :  { %3140 = vmatprep.subr.bf16.mxu0 %v3407_v2 }
  0x1b   :  { %3142 = vmatpush3.bf16.msra.mxu0 %v3577_v27 }
  0x1c   :  { %3161 = vmatprep.subr.bf16.mxu0 %v3407_v2 }
  0xda   :  { %v3581_v28 = vpop.f32.mrb[0].mxu1 }
  0xdb   :  { %v2839_v29 = vpop.f32.mrb[1].mxu1 }
  0xde   :  { %v303_v31 = vpop.f32.mrb[2].mxu1 }
  0xdf   :  { %v304_v32 = vadd.f32 %v303_v31, %v3581_v28  ;;  %v2844_v33 = vpop.f32.mrb[3].mxu1 }
  0xe1   :  { %v313_v35 = vadd.f32 %v3586_v30, %v304_v32  ;;  %v2832_v36 = vpop.f32.mrb[0].mxu0 }
  0xe2   :  { %v3593_v37 = vadd.f32 %v2832_v36, %v2644_v34  ;;  %v148_v38 = vpop.f32.mrb[1].mxu0 }
  0xe3   :  { %v314_v39 = vsel %vm75_vm1, %v313_v35, 0.0  ;;  %v3599_v40 = vadd.f32 %v2644_v34, %v148_v38 }
  0xe4   :  { %2862 = vmatmul.mubr.msk.f32.vlgmr.msra.gmra.mrb[2].mxu0 %vm315_vm4, %v314_v39 }
  0xe5   :  { %2907 = vmatprep.mubr.msk.f32.mxu0 %vm3408_vm0, %v3409_v4  ;;  %3163 = vmatpush3.bf16.msra.mxu0 %v3613_v55 }
  0xe6   :  { %3164 = vmatprep.subr.bf16.mxu0 %v3407_v2 }
  0xe9   :  { %3166 = vmatpush3.bf16.msra.mxu0 %v3619_v57 }
  0xea   :  { %2910 = vmatprep.subr.mxu0 %v3409_v4 }
 0x1b7   :  { %v385_v41 = vpop.f32.mrb[2].mxu0 }
 0x1b8   :  { %v386_v42 = vadd.f32 %v385_v41, %v3599_v40  ;;  %v2863_v43 = vpop.f32.mrb[3].mxu0 }
 0x1ba   :  { %396 = vrot.lane.b32.xlu0 %v386_v42, %s3410_s5  ;;  %v2651_v44 = vmul.f32 -1.442695, %v386_v42 }
 0x1bc   :  { %3289 = vpow2.f32 %v2651_v44 }
 0x1c6   :  { %v3290_v45 = vpop.eup %3289 }
 0x1c7   :  { %v392_v46 = vadd.f32 1.0, %v3290_v45 }
 0x1c9   :  { %3291 = vrcp.f32 %v392_v46 }
 0x1d3   :  { %v3292_v47 = vpop.eup %3291 }
 0x1d4   :  { %v406_v59 = vsub.f32 1.0, %v3292_v47  ;;  %v412_v61 = vmul.f32 0.0, %v3292_v47 }
 0x22c   :  { %v397_v48 = vpop.permute.xlu0 %396 }
 0x22d   :  { %v399_v49 = vmul.f32 %v3292_v47, %v397_v48 }
 0x22f   :  { %401 = vrot.lane.b32.xlu0 %v399_v49, %s3411_s25  ;;  %v617_v49 = vrot.slane %v3599_v40, 2 }
 0x2a1   :  { %v402_v50 = vpop.permute.xlu0 %401 }
 0x2a2   :  { %v404_v51 = vadd.f32 %v402_v50, %v386_v42 }
 0x2a4   :  { %3293 = vtanh.f32 %v404_v51 }
 0x2ae   :  { %v3294_v58 = vpop.eup %3293 }
 0x2af   :  { %408 = vrot.lane.b32.xlu1 %v3294_v58, %s3412_s17 }
 0x321   :  { %v409_v60 = vpop.permute.xlu1 %408 }
 0x322   :  { %v411_v62 = vmul.f32 %v409_v60, %v406_v59 }
 0x324   :  { %v3629_v63 = vadd.f32 %v412_v61, %v411_v62 }
 0x326   :  { %421 = vrot.lane.b32.xlu1 %v3629_v63, %s3412_s17  ;;  %v496_v0 = vmul.f32 %v3629_v63, %v3581_v28 }
 0x328   :  { %498 = vrot.lane.b32.xlu0 %v496_v0, %s3412_s17 }
 0x398   :  { %v422_v1 = vpop.permute.xlu1 %421 }
 0x399   :  { %2873 = vmatmul.mubr.msk.f32.vlgmr.msra.gmra.mrb[4].mxu1 %vm75_vm1, %v422_v1 }
 0x39a   :  { %v499_v3 = vpop.permute.xlu0 %498  ;;  %2876 = vmatpush3.msra.mxu1 %v3518_v12  ;;  %2877 = vmatprep.mubr.msk.f32.mxu1 %vm3408_vm0, %v3409_v4 }
 0x39b   :  { %v502_v5 = vsel %vm501_vm5, %v499_v3, 0.0  ;;  %3149 = vmatprep.subr.bf16.mxu1 %v3407_v2 }
 0x39c   :  { %503 = vadd.xlane.f32.xlu1 %v502_v5 }
 0x429   :  { %v504_v15 = vpop.xlane.xlu1 %503 }
 0x42a   :  { %v505_v16 = vadd.f32 %v504_v15, %v3581_v28 }
 0x46c   :  { %v491_v7 = vpop.f32.mrb[4].mxu1 }
 0x46d   :  { %v492_v8 = vadd.f32 %v3645_v6, %v491_v7  ;;  %v2874_v9 = vpop.f32.mrb[5].mxu1 }
 0x46f   :  { %v495_v10 = vmul.f32 %v492_v8, %v3527_v14 }
 0x471   :  { %v507_v11 = vsel %vm506_vm6, %v495_v10, -inf }
 0x472   :  { %508 = vmax.xlane.f32.xlu0 %v507_v11 }
 0x4ff   :  { %v509_v17 = vpop.xlane.xlu0 %508 }
 0x500   :  { %v510_v19 = vmax.f32 %v509_v17, %v505_v16 }
 0x502   :  { %v519_v20 = vsub.f32 %v505_v16, %v510_v19  ;;  %513 = vperm.xlu0 %3287, %v510_v19  }
 0x504   :  { %v520_v31 = vmul.f32 1.442695, %v519_v20 }
 0x581   :  { %v514_v22 = vpop.permute.xlu0 %513 }
 0x582   :  { %v516_v23 = vsub.f32 %v495_v10, %v514_v22 }
 0x584   :  { %v517_v25 = vmul.f32 1.442695, %v516_v23 }
 0x586   :  { %3295 = vpow2.f32 %v517_v25 }
 0x587   :  { %3297 = vpow2.f32 %v520_v31 }
 0x590   :  { %v3296_v26 = vpop.eup %3295 }
 0x591   :  { %v522_v29 = vsel %vm506_vm6, %v3296_v26, 0.0  ;;  %v3298_v32 = vpop.eup %3297 }
 0x592   :  { %523 = vadd.xlane.f32.xlu1 %v522_v29 }
 0x61f   :  { %v524_v33 = vpop.xlane.xlu1 %523 }
 0x620   :  { %v525_v34 = vadd.f32 %v3298_v32, %v524_v33 }
 0x622   :  { %3299 = vrcp.f32 %v525_v34 }
 0x62c   :  { %v3300_v35 = vpop.eup %3299 }
 0x62d   :  { %529 = vperm.xlu1 %3288, %v3300_v35   ;;  %v534_v36 = vmul.f32 %v3300_v35, %v3298_v32 }
 0x631   :  { %537 = vperm.xlu1 %3288, %v534_v36  }
 0x6ac   :  { %v530_v38 = vpop.permute.xlu1 %529 }
 0x6ad   :  { %v532_v39 = vmul.f32 %v3296_v26, %v530_v38 }
 0x6af   :  { %v533_v41 = vmul.f32 %v532_v39, %v3527_v14 }
 0x6b0   :  { %v538_v42 = vpop.permute.xlu1 %537 }
 0x6b1   :  { %2878 = vmatmul.mubr.msk.f32.vlgmr.msra.gmra.mrb[6].mxu1 %vm233_vm3, %v533_v41  ;;  %v540_v43 = vmul.f32 %v538_v42, %v3581_v28 }
 0x6b2   :  { %3151 = vmatpush3.bf16.msra.mxu1 %v3541_v18  ;;  %2896 = vmatprep.mubr.msk.f32.mxu1 %vm3408_vm0, %v3409_v4 }
 0x6b3   :  { %3152 = vmatprep.subr.bf16.mxu1 %v3407_v2 }
 0x6b6   :  { %3154 = vmatpush3.bf16.msra.mxu1 %v3554_v21 }
 0x6b7   :  { %3155 = vmatprep.subr.bf16.mxu1 %v3407_v2 }
 0x6ba   :  { %3157 = vmatpush3.bf16.msra.mxu1 %v3567_v24 }
 0x6bb   :  { %3158 = vmatprep.subr.bf16.mxu1 %v3407_v2 }
 0x6be   :  { %3160 = vmatpush3.bf16.msra.mxu1 %v3577_v27 }
 0x6bf   :  { %3179 = vmatprep.subr.bf16.mxu1 %v3407_v2 }
 0x784   :  { %v610_v44 = vpop.f32.mrb[6].mxu1 }
 0x785   :  { %v611_v45 = vadd.f32 %v610_v44, %v540_v43  ;;  %v2879_v46 = vpop.f32.mrb[7].mxu1 }
 0x787   :  { %v614_v47 = vadd.f32 %v3586_v30, %v611_v45 }
 0x789   :  { %v615_v48 = vsel %vm75_vm1, %v614_v47, %v3629_v63 }
 0x78a   :  { %2897 = vmatmul.mubr.msk.f32.vlgmr.msra.gmra.mrb[8].mxu1 %vm315_vm4, %v615_v48 }
 0x78b   :  { %3181 = vmatpush3.bf16.msra.mxu1 %v3613_v55  ;;  %2942 = vmatprep.mubr.msk.f32.mxu1 %vm3408_vm0, %v3409_v4 }
 0x78c   :  { %3182 = vmatprep.subr.bf16.mxu1 %v3407_v2 }
 0x78f   :  { %3184 = vmatpush3.bf16.msra.mxu1 %v3619_v57 }
 0x790   :  { %2945 = vmatprep.subr.mxu1 %v3409_v4 }
 0x85d   :  { %v688_v50 = vpop.f32.mrb[8].mxu1 }
 0x85e   :  { %v689_v51 = vadd.f32 %v688_v50, %v617_v49  ;;  %v2898_v52 = vpop.f32.mrb[9].mxu1 }
 0x860   :  { %699 = vrot.lane.b32.xlu1 %v689_v51, %s3410_s5  ;;  %v2656_v53 = vmul.f32 -1.442695, %v689_v51 }
 0x862   :  { %3301 = vpow2.f32 %v2656_v53 }
 0x86c   :  { %v3302_v54 = vpop.eup %3301 }
 0x86d   :  { %v695_v56 = vadd.f32 1.0, %v3302_v54  ;;  %v911_v54 = vrot.slane %v3599_v40, 4 }
 0x86f   :  { %3303 = vrcp.f32 %v695_v56 }
 0x879   :  { %v3304_v58 = vpop.eup %3303 }
 0x87a   :  { %v709_v1 = vsub.f32 1.0, %v3304_v58  ;;  %v715_v5 = vmul.f32 %v3304_v58, %v3629_v63 }
 0x8d2   :  { %v700_v59 = vpop.permute.xlu1 %699 }
 0x8d3   :  { %v702_v60 = vmul.f32 %v3304_v58, %v700_v59 }
 0x8d5   :  { %704 = vrot.lane.b32.xlu1 %v702_v60, %s3411_s25 }
 0x947   :  { %v705_v61 = vpop.permute.xlu1 %704 }
 0x948   :  { %v707_v62 = vadd.f32 %v705_v61, %v689_v51 }
 0x94a   :  { %3305 = vtanh.f32 %v707_v62 }
 0x954   :  { %v3306_v0 = vpop.eup %3305 }
 0x955   :  { %711 = vrot.lane.b32.xlu1 %v3306_v0, %s3412_s17 }
 0x9c7   :  { %v712_v3 = vpop.permute.xlu1 %711 }
 0x9c8   :  { %v714_v7 = vmul.f32 %v712_v3, %v709_v1 }
 0x9ca   :  { %v3680_v8 = vadd.f32 %v715_v5, %v714_v7 }
 0x9cc   :  { %718 = vrot.lane.b32.xlu1 %v3680_v8, %s3412_s17  ;;  %v793_v9 = vmul.f32 %v3680_v8, %v3581_v28 }
 0x9d0   :  { %795 = vrot.lane.b32.xlu1 %v793_v9, %s3412_s17 }
 0xa3e   :  { %v719_v10 = vpop.permute.xlu1 %718 }
 0xa3f   :  { %2908 = vmatmul.mubr.msk.f32.vlgmr.msra.gmra.mrb[4].mxu0 %vm75_vm1, %v719_v10 }
 0xa40   :  { %2911 = vmatpush3.msra.mxu0 %v3518_v12  ;;  %2912 = vmatprep.mubr.msk.f32.mxu0 %vm3408_vm0, %v3409_v4 }
 0xa41   :  { %3167 = vmatprep.subr.bf16.mxu0 %v3407_v2 }
 0xa42   :  { %v796_v11 = vpop.permute.xlu1 %795 }
 0xa43   :  { %v798_v13 = vsel %vm501_vm5, %v796_v11, 0.0 }
 0xa44   :  { %799 = vadd.xlane.f32.xlu0 %v798_v13 }
 0xad1   :  { %v800_v22 = vpop.xlane.xlu0 %799 }
 0xad2   :  { %v801_v23 = vadd.f32 %v800_v22, %v3581_v28 }
 0xb12   :  { %v788_v15 = vpop.f32.mrb[4].mxu0 }
 0xb13   :  { %v789_v16 = vadd.f32 %v3645_v6, %v788_v15  ;;  %v2909_v17 = vpop.f32.mrb[5].mxu0 }
 0xb15   :  { %v792_v19 = vmul.f32 %v789_v16, %v3527_v14 }
 0xb17   :  { %v802_v20 = vsel %vm506_vm6, %v792_v19, -inf }
 0xb18   :  { %803 = vmax.xlane.f32.xlu1 %v802_v20 }
 0xba5   :  { %v804_v25 = vpop.xlane.xlu1 %803 }
 0xba6   :  { %v805_v26 = vmax.f32 %v804_v25, %v801_v23 }
 0xba8   :  { %v814_v29 = vsub.f32 %v801_v23, %v805_v26  ;;  %808 = vperm.xlu0 %3287, %v805_v26  }
 0xbaa   :  { %v815_v36 = vmul.f32 1.442695, %v814_v29 }
 0xc27   :  { %v809_v31 = vpop.permute.xlu0 %808 }
 0xc28   :  { %v811_v32 = vsub.f32 %v792_v19, %v809_v31 }
 0xc2a   :  { %v812_v33 = vmul.f32 1.442695, %v811_v32 }
 0xc2c   :  { %3307 = vpow2.f32 %v812_v33 }
 0xc2d   :  { %3309 = vpow2.f32 %v815_v36 }
 0xc36   :  { %v3308_v34 = vpop.eup %3307 }
 0xc37   :  { %v817_v35 = vsel %vm506_vm6, %v3308_v34, 0.0  ;;  %v3310_v38 = vpop.eup %3309 }
 0xc38   :  { %818 = vadd.xlane.f32.xlu1 %v817_v35 }
 0xcc5   :  { %v819_v39 = vpop.xlane.xlu1 %818 }
 0xcc6   :  { %v820_v41 = vadd.f32 %v3310_v38, %v819_v39 }
 0xcc8   :  { %3311 = vrcp.f32 %v820_v41 }
 0xcd2   :  { %v3312_v42 = vpop.eup %3311 }
 0xcd3   :  { %824 = vperm.xlu1 %3288, %v3312_v42   ;;  %v829_v43 = vmul.f32 %v3312_v42, %v3310_v38 }
 0xcd5   :  { %832 = vperm.xlu0 %3287, %v829_v43  }
 0xd52   :  { %v825_v44 = vpop.permute.xlu1 %824 }
 0xd53   :  { %v827_v45 = vmul.f32 %v3308_v34, %v825_v44 }
 0xd54   :  { %v833_v47 = vpop.permute.xlu0 %832 }
 0xd55   :  { %v828_v46 = vmul.f32 %v827_v45, %v3527_v14  ;;  %v835_v48 = vmul.f32 %v833_v47, %v3581_v28 }
 0xd57   :  { %2913 = vmatmul.mubr.msk.f32.vlgmr.msra.gmra.mrb[6].mxu0 %vm233_vm3, %v828_v46 }
 0xd58   :  { %3169 = vmatpush3.bf16.msra.mxu0 %v3541_v18  ;;  %2931 = vmatprep.mubr.msk.f32.mxu0 %vm3408_vm0, %v3409_v4 }
 0xd59   :  { %3170 = vmatprep.subr.bf16.mxu0 %v3407_v2 }
 0xd5c   :  { %3172 = vmatpush3.bf16.msra.mxu0 %v3554_v21 }
 0xd5d   :  { %3173 = vmatprep.subr.bf16.mxu0 %v3407_v2 }
 0xd60   :  { %3175 = vmatpush3.bf16.msra.mxu0 %v3567_v24 }
 0xd61   :  { %3176 = vmatprep.subr.bf16.mxu0 %v3407_v2 }
 0xd64   :  { %3178 = vmatpush3.bf16.msra.mxu0 %v3577_v27 }
 0xd65   :  { %3197 = vmatprep.subr.bf16.mxu0 %v3407_v2 }
 0xe2a   :  { %v905_v49 = vpop.f32.mrb[6].mxu0 }
 0xe2b   :  { %v906_v50 = vadd.f32 %v905_v49, %v835_v48  ;;  %v2914_v51 = vpop.f32.mrb[7].mxu0 }
 0xe2d   :  { %v909_v52 = vadd.f32 %v3586_v30, %v906_v50 }
 0xe2f   :  { %v910_v53 = vsel %vm75_vm1, %v909_v52, %v3680_v8 }
 0xe30   :  { %2932 = vmatmul.mubr.msk.f32.vlgmr.msra.gmra.mrb[8].mxu0 %vm315_vm4, %v910_v53 }
 0xe31   :  { %3199 = vmatpush3.bf16.msra.mxu0 %v3613_v55  ;;  %2977 = vmatprep.mubr.msk.f32.mxu0 %vm3408_vm0, %v3409_v4 }
 0xe32   :  { %3200 = vmatprep.subr.bf16.mxu0 %v3407_v2 }
 0xe35   :  { %3202 = vmatpush3.bf16.msra.mxu0 %v3619_v57 }
 0xe36   :  { %2980 = vmatprep.subr.mxu0 %v3409_v4 }
 0xf03   :  { %v982_v56 = vpop.f32.mrb[8].mxu0 }
 0xf04   :  { %v983_v58 = vadd.f32 %v982_v56, %v911_v54  ;;  %v2933_v59 = vpop.f32.mrb[9].mxu0 }
 0xf06   :  { %993 = vrot.lane.b32.xlu0 %v983_v58, %s3410_s5  ;;  %v2660_v60 = vmul.f32 -1.442695, %v983_v58 }
 0xf08   :  { %3313 = vpow2.f32 %v2660_v60 }
 0xf12   :  { %v3314_v61 = vpop.eup %3313 }
 0xf13   :  { %v989_v62 = vadd.f32 1.0, %v3314_v61 }
 0xf15   :  { %3315 = vrcp.f32 %v989_v62  ;;  %v1205_v62 = vrot.slane %v3599_v40, 6 }
 0xf1f   :  { %v3316_v0 = vpop.eup %3315 }
 0xf20   :  { %v1003_v10 = vsub.f32 1.0, %v3316_v0  ;;  %v1009_v13 = vmul.f32 %v3316_v0, %v3680_v8 }
 0xf78   :  { %v994_v1 = vpop.permute.xlu0 %993 }
 0xf79   :  { %v996_v3 = vmul.f32 %v3316_v0, %v994_v1 }
 0xf7b   :  { %998 = vrot.lane.b32.xlu1 %v996_v3, %s3411_s25 }
 0xfed   :  { %v999_v5 = vpop.permute.xlu1 %998 }
 0xfee   :  { %v1001_v7 = vadd.f32 %v999_v5, %v983_v58 }
 0xff0   :  { %3317 = vtanh.f32 %v1001_v7 }
 0xffa   :  { %v3318_v9 = vpop.eup %3317 }
 0xffb   :  { %1005 = vrot.lane.b32.xlu0 %v3318_v9, %s3412_s17 }
0x106d   :  { %v1006_v11 = vpop.permute.xlu0 %1005 }
0x106e   :  { %v1008_v15 = vmul.f32 %v1006_v11, %v1003_v10 }
0x1070   :  { %v3726_v16 = vadd.f32 %v1009_v13, %v1008_v15 }
0x1072   :  { %1012 = vrot.lane.b32.xlu1 %v3726_v16, %s3412_s17  ;;  %v1087_v17 = vmul.f32 %v3726_v16, %v3581_v28 }
0x1074   :  { %1089 = vrot.lane.b32.xlu0 %v1087_v17, %s3412_s17 }
0x10e4   :  { %v1013_v19 = vpop.permute.xlu1 %1012 }
0x10e5   :  { %2943 = vmatmul.mubr.msk.f32.vlgmr.msra.gmra.mrb[10].mxu1 %vm75_vm1, %v1013_v19 }
0x10e6   :  { %v1090_v20 = vpop.permute.xlu0 %1089  ;;  %2946 = vmatpush3.msra.mxu1 %v3518_v12  ;;  %2947 = vmatprep.mubr.msk.f32.mxu1 %vm3408_vm0, %v3409_v4 }
0x10e7   :  { %v1092_v22 = vsel %vm501_vm5, %v1090_v20, 0.0  ;;  %3185 = vmatprep.subr.bf16.mxu1 %v3407_v2 }
0x10e8   :  { %1093 = vadd.xlane.f32.xlu1 %v1092_v22 }
0x1175   :  { %v1094_v32 = vpop.xlane.xlu1 %1093 }
0x1176   :  { %v1095_v33 = vadd.f32 %v1094_v32, %v3581_v28 }
0x11b8   :  { %v1082_v23 = vpop.f32.mrb[10].mxu1 }
0x11b9   :  { %v1083_v25 = vadd.f32 %v3645_v6, %v1082_v23  ;;  %v2944_v26 = vpop.f32.mrb[11].mxu1 }
0x11bb   :  { %v1086_v29 = vmul.f32 %v1083_v25, %v3527_v14 }
0x11bd   :  { %v1096_v31 = vsel %vm506_vm6, %v1086_v29, -inf }
0x11be   :  { %1097 = vmax.xlane.f32.xlu0 %v1096_v31 }
0x124b   :  { %v1098_v34 = vpop.xlane.xlu0 %1097 }
0x124c   :  { %v1099_v35 = vmax.f32 %v1098_v34, %v1095_v33 }
0x124e   :  { %v1108_v36 = vsub.f32 %v1095_v33, %v1099_v35  ;;  %1102 = vperm.xlu0 %3287, %v1099_v35  }
0x1250   :  { %v1109_v44 = vmul.f32 1.442695, %v1108_v36 }
0x12cd   :  { %v1103_v38 = vpop.permute.xlu0 %1102 }
0x12ce   :  { %v1105_v39 = vsub.f32 %v1086_v29, %v1103_v38 }
0x12d0   :  { %v1106_v41 = vmul.f32 1.442695, %v1105_v39 }
0x12d2   :  { %3319 = vpow2.f32 %v1106_v41 }
0x12d3   :  { %3321 = vpow2.f32 %v1109_v44 }
0x12dc   :  { %v3320_v42 = vpop.eup %3319 }
0x12dd   :  { %v1111_v43 = vsel %vm506_vm6, %v3320_v42, 0.0  ;;  %v3322_v45 = vpop.eup %3321 }
0x12de   :  { %1112 = vadd.xlane.f32.xlu1 %v1111_v43 }
0x136b   :  { %v1113_v46 = vpop.xlane.xlu1 %1112 }
0x136c   :  { %v1114_v47 = vadd.f32 %v3322_v45, %v1113_v46 }
0x136e   :  { %3323 = vrcp.f32 %v1114_v47 }
0x1378   :  { %v3324_v48 = vpop.eup %3323 }
0x1379   :  { %1118 = vperm.xlu1 %3288, %v3324_v48   ;;  %v1123_v49 = vmul.f32 %v3324_v48, %v3322_v45 }
0x137b   :  { %1126 = vperm.xlu0 %3287, %v1123_v49  }
0x13f8   :  { %v1119_v50 = vpop.permute.xlu1 %1118 }
0x13f9   :  { %v1121_v51 = vmul.f32 %v3320_v42, %v1119_v50 }
0x13fa   :  { %v1127_v53 = vpop.permute.xlu0 %1126 }
0x13fb   :  { %v1122_v52 = vmul.f32 %v1121_v51, %v3527_v14  ;;  %v1129_v54 = vmul.f32 %v1127_v53, %v3581_v28 }
0x13fd   :  { %2948 = vmatmul.mubr.msk.f32.vlgmr.msra.gmra.mrb[12].mxu1 %vm233_vm3, %v1122_v52 }
0x13fe   :  { %3187 = vmatpush3.bf16.msra.mxu1 %v3541_v18  ;;  %2966 = vmatprep.mubr.msk.f32.mxu1 %vm3408_vm0, %v3409_v4 }
0x13ff   :  { %3188 = vmatprep.subr.bf16.mxu1 %v3407_v2 }
0x1402   :  { %3190 = vmatpush3.bf16.msra.mxu1 %v3554_v21 }
0x1403   :  { %3191 = vmatprep.subr.bf16.mxu1 %v3407_v2 }
0x1406   :  { %3193 = vmatpush3.bf16.msra.mxu1 %v3567_v24 }
0x1407   :  { %3194 = vmatprep.subr.bf16.mxu1 %v3407_v2 }
0x140a   :  { %3196 = vmatpush3.bf16.msra.mxu1 %v3577_v27 }
0x140b   :  { %3215 = vmatprep.subr.bf16.mxu1 %v3407_v2 }
0x14d0   :  { %v1199_v56 = vpop.f32.mrb[12].mxu1 }
0x14d1   :  { %v1200_v58 = vadd.f32 %v1199_v56, %v1129_v54  ;;  %v2949_v59 = vpop.f32.mrb[13].mxu1 }
0x14d3   :  { %v1203_v60 = vadd.f32 %v3586_v30, %v1200_v58 }
0x14d5   :  { %v1204_v61 = vsel %vm75_vm1, %v1203_v60, %v3726_v16 }
0x14d6   :  { %2967 = vmatmul.mubr.msk.f32.vlgmr.msra.gmra.mrb[14].mxu1 %vm315_vm4, %v1204_v61 }
0x14d7   :  { %3217 = vmatpush3.bf16.msra.mxu1 %v3613_v55  ;;  %3012 = vmatprep.mubr.msk.f32.mxu1 %vm3408_vm0, %v3409_v4 }
0x14d8   :  { %3218 = vmatprep.subr.bf16.mxu1 %v3407_v2 }
0x14db   :  { %3220 = vmatpush3.bf16.msra.mxu1 %v3619_v57 }
0x14dc   :  { %3015 = vmatprep.subr.mxu1 %v3409_v4 }
0x15a9   :  { %v1276_v0 = vpop.f32.mrb[14].mxu1 }
0x15aa   :  { %v1277_v1 = vadd.f32 %v1276_v0, %v1205_v62  ;;  %v2968_v3 = vpop.f32.mrb[15].mxu1 }
0x15ac   :  { %1287 = vrot.lane.b32.xlu1 %v1277_v1, %s3410_s5  ;;  %v2664_v5 = vmul.f32 -1.442695, %v1277_v1 }
0x15ae   :  { %3325 = vpow2.f32 %v2664_v5 }
0x15b8   :  { %v3326_v7 = vpop.eup %3325 }
0x15b9   :  { %v1283_v9 = vadd.f32 1.0, %v3326_v7 }
0x15bb   :  { %3327 = vrcp.f32 %v1283_v9 }
0x15c5   :  { %v3328_v10 = vpop.eup %3327 }
0x15c6   :  { %v1297_v40 = vsub.f32 1.0, %v3328_v10  ;;  %v1303_v22 = vmul.f32 %v3328_v10, %v3726_v16 }
0x161e   :  { %v1288_v11 = vpop.permute.xlu1 %1287 }
0x161f   :  { %v1290_v13 = vmul.f32 %v3328_v10, %v1288_v11 }
0x1621   :  { %1292 = vrot.lane.b32.xlu0 %v1290_v13, %s3411_s25 }
0x1693   :  { %v1293_v15 = vpop.permute.xlu0 %1292 }
0x1694   :  { %v1295_v17 = vadd.f32 %v1293_v15, %v1277_v1 }
0x1696   :  { %3329 = vtanh.f32 %v1295_v17 }
0x16a0   :  { %v3330_v19 = vpop.eup %3329 }
0x16a1   :  { %1299 = vrot.lane.b32.xlu1 %v3330_v19, %s3412_s17 }
0x1713   :  { %v1300_v20 = vpop.permute.xlu1 %1299 }
0x1714   :  { %v1302_v23 = vmul.f32 %v1300_v20, %v1297_v40 }
0x1716   :  { %v3772_v25 = vadd.f32 %v1303_v22, %v1302_v23 }
0x1718   :  { %1306 = vrot.lane.b32.xlu0 %v3772_v25, %s3412_s17  ;;  %v1381_v26 = vmul.f32 %v3772_v25, %v3581_v28 }
0x171a   :  { %1383 = vrot.lane.b32.xlu1 %v1381_v26, %s3412_s17 }
0x178a   :  { %v1307_v29 = vpop.permute.xlu0 %1306 }
0x178b   :  { %2978 = vmatmul.mubr.msk.f32.vlgmr.msra.gmra.mrb[10].mxu0 %vm75_vm1, %v1307_v29 }
0x178c   :  { %v1384_v31 = vpop.permute.xlu1 %1383  ;;  %2981 = vmatpush3.msra.mxu0 %v3518_v12  ;;  %2982 = vmatprep.mubr.msk.f32.mxu0 %vm3408_vm0, %v3409_v4 }
0x178d   :  { %v1386_v32 = vsel %vm501_vm5, %v1384_v31, 0.0  ;;  %3203 = vmatprep.subr.bf16.mxu0 %v3407_v2 }
0x178e   :  { %1387 = vadd.xlane.f32.xlu0 %v1386_v32 }
0x181b   :  { %v1388_v39 = vpop.xlane.xlu0 %1387 }
0x181c   :  { %v1389_v41 = vadd.f32 %v1388_v39, %v3581_v28 }
0x185e   :  { %v1376_v33 = vpop.f32.mrb[10].mxu0 }
0x185f   :  { %v1377_v34 = vadd.f32 %v3645_v6, %v1376_v33  ;;  %v2979_v35 = vpop.f32.mrb[11].mxu0 }
0x1861   :  { %v1380_v36 = vmul.f32 %v1377_v34, %v3527_v14 }
0x1863   :  { %v1390_v38 = vsel %vm506_vm6, %v1380_v36, -inf }
0x1864   :  { %1391 = vmax.xlane.f32.xlu1 %v1390_v38 }
0x18f1   :  { %v1392_v42 = vpop.xlane.xlu1 %1391 }
0x18f2   :  { %v1393_v43 = vmax.f32 %v1392_v42, %v1389_v41 }
0x18f4   :  { %v1402_v44 = vsub.f32 %v1389_v41, %v1393_v43  ;;  %1396 = vperm.xlu0 %3287, %v1393_v43  }
0x18f6   :  { %v1403_v50 = vmul.f32 1.442695, %v1402_v44 }
0x1973   :  { %v1397_v45 = vpop.permute.xlu0 %1396 }
0x1974   :  { %v1399_v46 = vsub.f32 %v1380_v36, %v1397_v45 }
0x1976   :  { %v1400_v47 = vmul.f32 1.442695, %v1399_v46 }
0x1978   :  { %3331 = vpow2.f32 %v1400_v47 }
0x1979   :  { %3333 = vpow2.f32 %v1403_v50 }
0x1982   :  { %v3332_v48 = vpop.eup %3331 }
0x1983   :  { %v1405_v49 = vsel %vm506_vm6, %v3332_v48, 0.0  ;;  %v3334_v51 = vpop.eup %3333 }
0x1984   :  { %1406 = vadd.xlane.f32.xlu1 %v1405_v49 }
0x1a11   :  { %v1407_v52 = vpop.xlane.xlu1 %1406 }
0x1a12   :  { %v1408_v53 = vadd.f32 %v3334_v51, %v1407_v52 }
0x1a14   :  { %3335 = vrcp.f32 %v1408_v53 }
0x1a1e   :  { %v3336_v54 = vpop.eup %3335 }
0x1a1f   :  { %1412 = vperm.xlu1 %3288, %v3336_v54   ;;  %v1417_v56 = vmul.f32 %v3336_v54, %v3334_v51 }
0x1a21   :  { %1420 = vperm.xlu0 %3287, %v1417_v56  }
0x1a9e   :  { %v1413_v58 = vpop.permute.xlu1 %1412 }
0x1a9f   :  { %v1415_v59 = vmul.f32 %v3332_v48, %v1413_v58 }
0x1aa0   :  { %v1421_v61 = vpop.permute.xlu0 %1420 }
0x1aa1   :  { %v1416_v60 = vmul.f32 %v1415_v59, %v3527_v14  ;;  %v1423_v62 = vmul.f32 %v1421_v61, %v3581_v28 }
0x1aa3   :  { %2983 = vmatmul.mubr.msk.f32.vlgmr.msra.gmra.mrb[12].mxu0 %vm233_vm3, %v1416_v60 }
0x1aa4   :  { %3205 = vmatpush3.bf16.msra.mxu0 %v3541_v18  ;;  %3001 = vmatprep.mubr.msk.f32.mxu0 %vm3408_vm0, %v3409_v4 }
0x1aa5   :  { %3206 = vmatprep.subr.bf16.mxu0 %v3407_v2 }
0x1aa8   :  { %3208 = vmatpush3.bf16.msra.mxu0 %v3554_v21 }
0x1aa9   :  { %3209 = vmatprep.subr.bf16.mxu0 %v3407_v2 }
0x1aac   :  { %3211 = vmatpush3.bf16.msra.mxu0 %v3567_v24 }
0x1aad   :  { %3212 = vmatprep.subr.bf16.mxu0 %v3407_v2 }
0x1ab0   :  { %3214 = vmatpush3.bf16.msra.mxu0 %v3577_v27 }
0x1ab1   :  { %3233 = vmatprep.subr.bf16.mxu0 %v3407_v2 }
0x1b76   :  { %v1493_v0 = vpop.f32.mrb[12].mxu0 }
0x1b77   :  { %v1494_v1 = vadd.f32 %v1493_v0, %v1423_v62  ;;  %v2984_v3 = vpop.f32.mrb[13].mxu0 }
0x1b79   :  { %v1497_v5 = vadd.f32 %v3586_v30, %v1494_v1 }
0x1b7b   :  { %v1498_v7 = vsel %vm75_vm1, %v1497_v5, %v3772_v25 }
0x1b7c   :  { %3002 = vmatmul.mubr.msk.f32.vlgmr.msra.gmra.mrb[14].mxu0 %vm315_vm4, %v1498_v7 }
0x1b7d   :  { %3235 = vmatpush3.bf16.msra.mxu0 %v3613_v55  ;;  %3047 = vmatprep.mubr.msk.f32.mxu0 %vm3408_vm0, %v3409_v4 }
0x1b7e   :  { %3236 = vmatprep.subr.bf16.mxu0 %v3407_v2 }
0x1b81   :  { %3238 = vmatpush3.bf16.msra.mxu0 %v3619_v57 }
0x1b82   :  { %3050 = vmatprep.subr.mxu0 %v3409_v4 }
0x1c4f   :  { %v1568_v9 = vpop.f32.mrb[14].mxu0 }
0x1c50   :  { %v1569_v10 = vadd.f32 %v1568_v9, %v3593_v37  ;;  %v3003_v11 = vpop.f32.mrb[15].mxu0 }
0x1c52   :  { %1579 = vrot.lane.b32.xlu0 %v1569_v10, %s3410_s5  ;;  %v2668_v13 = vmul.f32 -1.442695, %v1569_v10 }
0x1c54   :  { %3337 = vpow2.f32 %v2668_v13 }
0x1c5e   :  { %v3338_v15 = vpop.eup %3337 }
0x1c5f   :  { %v1575_v17 = vadd.f32 1.0, %v3338_v15  ;;  %v1792_v15 = vrot.slane %v3593_v37, 2 }
0x1c61   :  { %3339 = vrcp.f32 %v1575_v17 }
0x1c6b   :  { %v3340_v19 = vpop.eup %3339 }
0x1c6c   :  { %v1589_v29 = vsub.f32 1.0, %v3340_v19  ;;  %v1595_v32 = vmul.f32 %v3340_v19, %v3772_v25 }
0x1cc4   :  { %v1580_v40 = vpop.permute.xlu0 %1579 }
0x1cc5   :  { %v1582_v20 = vmul.f32 %v3340_v19, %v1580_v40 }
0x1cc7   :  { %1584 = vrot.lane.b32.xlu1 %v1582_v20, %s3411_s25 }
0x1d39   :  { %v1585_v22 = vpop.permute.xlu1 %1584 }
0x1d3a   :  { %v1587_v23 = vadd.f32 %v1585_v22, %v1569_v10 }
0x1d3c   :  { %3341 = vtanh.f32 %v1587_v23 }
0x1d46   :  { %v3342_v26 = vpop.eup %3341 }
0x1d47   :  { %1591 = vrot.lane.b32.xlu0 %v3342_v26, %s3412_s17 }
0x1db9   :  { %v1592_v31 = vpop.permute.xlu0 %1591 }
0x1dba   :  { %v1594_v33 = vmul.f32 %v1592_v31, %v1589_v29 }
0x1dbc   :  { %v3818_v34 = vadd.f32 %v1595_v32, %v1594_v33 }
0x1dbe   :  { %1598 = vrot.lane.b32.xlu1 %v3818_v34, %s3412_s17  ;;  %v1673_v35 = vmul.f32 %v3818_v34, %v3581_v28 }
0x1dc0   :  { %1675 = vrot.lane.b32.xlu0 %v1673_v35, %s3412_s17 }
0x1e30   :  { %v1599_v36 = vpop.permute.xlu1 %1598 }
0x1e31   :  { %3013 = vmatmul.mubr.msk.f32.vlgmr.msra.gmra.mrb[16].mxu1 %vm75_vm1, %v1599_v36 }
0x1e32   :  { %v1676_v38 = vpop.permute.xlu0 %1675  ;;  %3016 = vmatpush3.msra.mxu1 %v3518_v12  ;;  %3017 = vmatprep.mubr.msk.f32.mxu1 %vm3408_vm0, %v3409_v4 }
0x1e33   :  { %v1678_v39 = vsel %vm501_vm5, %v1676_v38, 0.0  ;;  %3221 = vmatprep.subr.bf16.mxu1 %v3407_v2 }
0x1e34   :  { %1679 = vadd.xlane.f32.xlu1 %v1678_v39 }
0x1ec1   :  { %v1680_v46 = vpop.xlane.xlu1 %1679 }
0x1ec2   :  { %v1681_v12 = vadd.f32 %v1680_v46, %v3581_v28 }
0x1f04   :  { %v1668_v41 = vpop.f32.mrb[16].mxu1 }
0x1f05   :  { %v1669_v42 = vadd.f32 %v3645_v6, %v1668_v41  ;;  %v3014_v43 = vpop.f32.mrb[17].mxu1 }
0x1f06   :  { %v3875_v43 = vld [vmem:[%s4016_s8] sm:$0xff] }
0x1f07   :  { %v1672_v44 = vmul.f32 %v1669_v42, %v3527_v14 }
0x1f09   :  { %v1682_v45 = vsel %vm506_vm6, %v1672_v44, -inf }
0x1f0a   :  { %1683 = vmax.xlane.f32.xlu0 %v1682_v45 }
0x1f97   :  { %v1684_v47 = vpop.xlane.xlu0 %1683 }
0x1f98   :  { %v1685_v48 = vmax.f32 %v1684_v47, %v1681_v12  ;;  %v3886_v47 = vld [vmem:[%s4009_s1] sm:$0x3] }
0x1f9a   :  { %v1694_v49 = vsub.f32 %v1681_v12, %v1685_v48  ;;  %1688 = vperm.xlu0 %3287, %v1685_v48  }
0x1f9c   :  { %v1695_v56 = vmul.f32 1.442695, %v1694_v49 }
0x2019   :  { %v1689_v50 = vpop.permute.xlu0 %1688 }
0x201a   :  { %v1691_v51 = vsub.f32 %v1672_v44, %v1689_v50 }
0x201c   :  { %v1692_v52 = vmul.f32 1.442695, %v1691_v51 }
0x201e   :  { %3343 = vpow2.f32 %v1692_v52 }
0x201f   :  { %3345 = vpow2.f32 %v1695_v56 }
0x2028   :  { %v3344_v53 = vpop.eup %3343 }
0x2029   :  { %v1697_v54 = vsel %vm506_vm6, %v3344_v53, 0.0  ;;  %v3346_v58 = vpop.eup %3345 }
0x202a   :  { %1698 = vadd.xlane.f32.xlu1 %v1697_v54 }
0x20b7   :  { %v1699_v59 = vpop.xlane.xlu1 %1698 }
0x20b8   :  { %v1700_v60 = vadd.f32 %v3346_v58, %v1699_v59 }
0x20ba   :  { %3347 = vrcp.f32 %v1700_v60 }
0x20c4   :  { %v3348_v61 = vpop.eup %3347 }
0x20c5   :  { %1704 = vperm.xlu1 %3288, %v3348_v61   ;;  %v1709_v62 = vmul.f32 %v3348_v61, %v3346_v58 }
0x20c7   :  { %1712 = vperm.xlu0 %3287, %v1709_v62  }
0x2144   :  { %v1705_v0 = vpop.permute.xlu1 %1704 }
0x2145   :  { %v1707_v1 = vmul.f32 %v3344_v53, %v1705_v0 }
0x2147   :  { %v1708_v3 = vmul.f32 %v1707_v1, %v3527_v14  ;;  %v1713_v14 = vpop.permute.xlu0 %1712 }
0x2148   :  { %v1715_v5 = vmul.f32 %v1713_v14, %v3581_v28 }
0x2149   :  { %3018 = vmatmul.mubr.msk.f32.vlgmr.msra.gmra.mrb[18].mxu1 %vm233_vm3, %v1708_v3 }
0x214a   :  { %3223 = vmatpush3.bf16.msra.mxu1 %v3541_v18  ;;  %3036 = vmatprep.mubr.msk.f32.mxu1 %vm3408_vm0, %v3409_v4 }
0x214b   :  { %3224 = vmatprep.subr.bf16.mxu1 %v3407_v2 }
0x214e   :  { %3226 = vmatpush3.bf16.msra.mxu1 %v3554_v21 }
0x214f   :  { %3227 = vmatprep.subr.bf16.mxu1 %v3407_v2 }
0x2152   :  { %3229 = vmatpush3.bf16.msra.mxu1 %v3567_v24 }
0x2153   :  { %3230 = vmatprep.subr.bf16.mxu1 %v3407_v2 }
0x2156   :  { %3232 = vmatpush3.bf16.msra.mxu1 %v3577_v27 }
0x2157   :  { %3251 = vmatprep.subr.bf16.mxu1 %v3407_v2 }
0x221c   :  { %v1785_v7 = vpop.f32.mrb[18].mxu1 }
0x221d   :  { %v1786_v9 = vadd.f32 %v1785_v7, %v1715_v5  ;;  %v3019_v10 = vpop.f32.mrb[19].mxu1 }
0x221f   :  { %v1789_v11 = vadd.f32 %v3586_v30, %v1786_v9 }
0x2221   :  { %v1790_v13 = vsel %vm75_vm1, %v1789_v11, %v3818_v34 }
0x2222   :  { %3037 = vmatmul.mubr.msk.f32.vlgmr.msra.gmra.mrb[20].mxu1 %vm315_vm4, %v1790_v13 }
0x2223   :  { %3253 = vmatpush3.bf16.msra.mxu1 %v3613_v55  ;;  %3082 = vmatprep.mubr.msk.f32.mxu1 %vm3408_vm0, %v3409_v4 }
0x2224   :  { %3254 = vmatprep.subr.bf16.mxu1 %v3407_v2 }
0x2227   :  { %3256 = vmatpush3.bf16.msra.mxu1 %v3619_v57 }
0x2228   :  { %3085 = vmatprep.subr.mxu1 %v3409_v4 }
0x22f5   :  { %v1863_v17 = vpop.f32.mrb[20].mxu1 }
0x22f6   :  { %v1864_v30 = vadd.f32 %v1863_v17, %v1792_v15  ;;  %v3038_v19 = vpop.f32.mrb[21].mxu1 }
0x22f8   :  { %1874 = vrot.lane.b32.xlu1 %v1864_v30, %s3410_s5  ;;  %v2672_v40 = vmul.f32 -1.442695, %v1864_v30 }
0x22fa   :  { %3349 = vpow2.f32 %v2672_v40 }
0x2304   :  { %v3350_v20 = vpop.eup %3349 }
0x2305   :  { %v1870_v55 = vadd.f32 1.0, %v3350_v20  ;;  %v2086_v20 = vrot.slane %v3593_v37, 4 }
0x2307   :  { %3351 = vrcp.f32 %v1870_v55 }
0x2311   :  { %v3352_v22 = vpop.eup %3351 }
0x2312   :  { %v1884_v32 = vsub.f32 1.0, %v3352_v22  ;;  %v1890_v35 = vmul.f32 %v3352_v22, %v3818_v34 }
0x236a   :  { %v1875_v23 = vpop.permute.xlu1 %1874 }
0x236b   :  { %v1877_v26 = vmul.f32 %v3352_v22, %v1875_v23 }
0x236d   :  { %1879 = vrot.lane.b32.xlu0 %v1877_v26, %s3411_s25 }
0x23df   :  { %v1880_v57 = vpop.permute.xlu0 %1879 }
0x23e0   :  { %v1882_v29 = vadd.f32 %v1880_v57, %v1864_v30  ;;  %v3907_v30 = vld [vmem:[%s4017_s9] ss:$0 sm:$0xff] }
0x23e2   :  { %3353 = vtanh.f32 %v1882_v29 }
0x23ec   :  { %v3354_v31 = vpop.eup %3353 }
0x23ed   :  { %1886 = vrot.lane.b32.xlu1 %v3354_v31, %s3412_s17 }
0x245f   :  { %v1887_v33 = vpop.permute.xlu1 %1886 }
0x2460   :  { %v1889_v36 = vmul.f32 %v1887_v33, %v1884_v32 }
0x2462   :  { %v3864_v38 = vadd.f32 %v1890_v35, %v1889_v36 }
0x2464   :  { %1893 = vrot.lane.b32.xlu0 %v3864_v38, %s3412_s17  ;;  %v1968_v39 = vmul.f32 %v3864_v38, %v3581_v28 }
0x2466   :  { %1970 = vrot.lane.b32.xlu1 %v1968_v39, %s3412_s17 }
0x24d6   :  { %v1894_v41 = vpop.permute.xlu0 %1893 }
0x24d7   :  { %3048 = vmatmul.mubr.msk.f32.vlgmr.msra.gmra.mrb[16].mxu0 %vm75_vm1, %v1894_v41 }
0x24d8   :  { %v1971_v42 = vpop.permute.xlu1 %1970  ;;  %3051 = vmatpush3.msra.mxu0 %v3875_v43  ;;  %3052 = vmatprep.mubr.msk.f32.mxu0 %vm3408_vm0, %v3409_v4 }
0x24d9   :  { %v1973_v44 = vsel %vm501_vm5, %v1971_v42, 0.0  ;;  %3239 = vmatprep.subr.bf16.mxu0 %v3407_v2 }
0x24da   :  { %1974 = vadd.xlane.f32.xlu0 %v1973_v44 }
0x2567   :  { %v1975_v50 = vpop.xlane.xlu0 %1974 }
0x2568   :  { %v1976_v51 = vadd.f32 %v1975_v50, %v3581_v28 }
0x25aa   :  { %v1963_v45 = vpop.f32.mrb[16].mxu0 }
0x25ab   :  { %v1964_v46 = vadd.f32 %v3645_v6, %v1963_v45  ;;  %v3049_v12 = vpop.f32.mrb[17].mxu0 }
0x25ad   :  { %v1967_v48 = vmul.f32 %v3886_v47, %v1964_v46 }
0x25af   :  { %v1977_v49 = vsel %vm506_vm6, %v1967_v48, -inf }
0x25b0   :  { %1978 = vmax.xlane.f32.xlu1 %v1977_v49 }
0x263d   :  { %v1979_v52 = vpop.xlane.xlu1 %1978 }
0x263e   :  { %v1980_v53 = vmax.f32 %v1979_v52, %v1976_v51  ;;  %v3382_v52 = vld [vmem:[%s4015_s7] ss:$0 sm:$0xff] }
0x2640   :  { %v1989_v54 = vsub.f32 %v1976_v51, %v1980_v53  ;;  %1983 = vperm.xlu0 %3287, %v1980_v53  }
0x2642   :  { %v1990_v61 = vmul.f32 1.442695, %v1989_v54 }
0x26bf   :  { %v1984_v56 = vpop.permute.xlu0 %1983 }
0x26c0   :  { %v1986_v6 = vsub.f32 %v1967_v48, %v1984_v56 }
0x26c2   :  { %v1987_v58 = vmul.f32 1.442695, %v1986_v6 }
0x26c4   :  { %3355 = vpow2.f32 %v1987_v58 }
0x26c5   :  { %3357 = vpow2.f32 %v1990_v61 }
0x26ce   :  { %v3356_v59 = vpop.eup %3355 }
0x26cf   :  { %v1992_v60 = vsel %vm506_vm6, %v3356_v59, 0.0  ;;  %v3358_v62 = vpop.eup %3357 }
0x26d0   :  { %1993 = vadd.xlane.f32.xlu1 %v1992_v60 }
0x275d   :  { %v1994_v0 = vpop.xlane.xlu1 %1993 }
0x275e   :  { %v1995_v1 = vadd.f32 %v3358_v62, %v1994_v0 }
0x2760   :  { %3359 = vrcp.f32 %v1995_v1 }
0x276a   :  { %v3360_v3 = vpop.eup %3359 }
0x276b   :  { %1999 = vperm.xlu1 %3288, %v3360_v3   ;;  %v2004_v14 = vmul.f32 %v3360_v3, %v3358_v62 }
0x276d   :  { %2007 = vperm.xlu0 %3287, %v2004_v14  }
0x27ea   :  { %v2000_v5 = vpop.permute.xlu1 %1999 }
0x27eb   :  { %v2002_v7 = vmul.f32 %v3356_v59, %v2000_v5 }
0x27ec   :  { %v2008_v10 = vpop.permute.xlu0 %2007 }
0x27ed   :  { %v2003_v9 = vmul.f32 %v3886_v47, %v2002_v7  ;;  %v2010_v11 = vmul.f32 %v2008_v10, %v3581_v28 }
0x27ef   :  { %3053 = vmatmul.mubr.msk.f32.vlgmr.msra.gmra.mrb[18].mxu0 %vm233_vm3, %v2003_v9 }
0x27f0   :  { %3241 = vmatpush3.bf16.msra.mxu0 %v3541_v18  ;;  %3071 = vmatprep.mubr.msk.f32.mxu0 %vm3408_vm0, %v3409_v4 }
0x27f1   :  { %3242 = vmatprep.subr.bf16.mxu0 %v3407_v2 }
0x27f4   :  { %3244 = vmatpush3.bf16.msra.mxu0 %v3554_v21 }
0x27f5   :  { %3245 = vmatprep.subr.bf16.mxu0 %v3407_v2 }
0x27f8   :  { %3247 = vmatpush3.bf16.msra.mxu0 %v3567_v24 }
0x27f9   :  { %3248 = vmatprep.subr.bf16.mxu0 %v3407_v2 }
0x27fc   :  { %3250 = vmatpush3.bf16.msra.mxu0 %v3577_v27 }
0x28c2   :  { %v2080_v13 = vpop.f32.mrb[18].mxu0 }
0x28c3   :  { %v2081_v15 = vadd.f32 %v2080_v13, %v2010_v11  ;;  %v3054_v17 = vpop.f32.mrb[19].mxu0 }
0x28c5   :  { %v2084_v19 = vadd.f32 %v3907_v30, %v2081_v15 }
0x28c7   :  { %v2085_v40 = vsel %vm75_vm1, %v2084_v19, %v3864_v38 }
0x28c8   :  { %3072 = vmatmul.mubr.msk.f32.vlgmr.msra.gmra.mrb[20].mxu0 %vm315_vm4, %v2085_v40 }
0x299b   :  { %v2157_v55 = vpop.f32.mrb[20].mxu0 }
0x299c   :  { %v2158_v22 = vadd.f32 %v2157_v55, %v2086_v20  ;;  %v3073_v23 = vpop.f32.mrb[21].mxu0 }
0x299e   :  { %2168 = vrot.lane.b32.xlu0 %v2158_v22, %s3410_s5  ;;  %v2676_v26 = vmul.f32 -1.442695, %v2158_v22 }
0x29a0   :  { %3361 = vpow2.f32 %v2676_v26 }
0x29aa   :  { %v3362_v57 = vpop.eup %3361 }
0x29ab   :  { %v2164_v29 = vadd.f32 1.0, %v3362_v57 }
0x29ad   :  { %3363 = vrcp.f32 %v2164_v29 }
0x29b7   :  { %v3364_v31 = vpop.eup %3363 }
0x29b8   :  { %v2178_v41 = vsub.f32 1.0, %v3364_v31  ;;  %v2184_v44 = vmul.f32 %v3364_v31, %v3864_v38 }
0x2a10   :  { %v2169_v32 = vpop.permute.xlu0 %2168 }
0x2a11   :  { %v2171_v33 = vmul.f32 %v3364_v31, %v2169_v32 }
0x2a13   :  { %2173 = vrot.lane.b32.xlu1 %v2171_v33, %s3411_s25  ;;  %v2531_v33 = vld [vmem:[%s4019_s11 + $0x8] sm:$0xff] }
0x2a85   :  { %v2174_v35 = vpop.permute.xlu1 %2173 }
0x2a86   :  { %v2176_v36 = vadd.f32 %v2174_v35, %v2158_v22  ;;  %v2532_v35 = vld [vmem:[%s4019_s11 + $0x10] sm:$0xff] }
0x2a88   :  { %3365 = vtanh.f32 %v2176_v36 }
0x2a92   :  { %v3366_v39 = vpop.eup %3365 }
0x2a93   :  { %2180 = vrot.lane.b32.xlu0 %v3366_v39, %s3412_s17  ;;  %v2533_v39 = vld [vmem:[%s4019_s11 + $0x18] sm:$0xff] }
0x2b05   :  { %v2181_v42 = vpop.permute.xlu0 %2180 }
0x2b06   :  { %v2183_v45 = vmul.f32 %v2181_v42, %v2178_v41  ;;  %v3273_v41 = vpack.c.bf16 %v2533_v39, %v2532_v35 }
0x2b08   :  { %v3918_v46 = vadd.f32 %v2184_v44, %v2183_v45  ;;  %v2480_v44 = vrot.slane %v3680_v8, 7  ;;  %v2497_v45 = vrot.slane %v3726_v16, 7 }
0x2b0a   :  { %2187 = vrot.lane.b32.xlu1 %v3918_v46, %s3412_s17  ;;  %v2262_v12 = vmul.f32 %v3918_v46, %v3581_v28 }
0x2b0c   :  { %2264 = vrot.lane.b32.xlu0 %v2262_v12, %s3412_s17  ;;  %v2495_v12 = vrot.slane %v3629_v63, 1 }
0x2b7c   :  { %v2188_v48 = vpop.permute.xlu1 %2187 }
0x2b7d   :  { %3083 = vmatmul.mubr.msk.f32.vlgmr.msra.gmra.mrb[22].mxu1 %vm75_vm1, %v2188_v48  ;;  %v2523_v48 = vsel %vm2509_vm7, %v2495_v12, %v3680_v8 }
0x2b7e   :  { %v2265_v49 = vpop.permute.xlu0 %2264  ;;  %3086 = vmatpush3.msra.mxu1 %v3875_v43  ;;  %3087 = vmatprep.mubr.msk.f32.mxu1 %vm3408_vm0, %v3409_v4 }
0x2b7f   :  { %v2267_v50 = vsel %vm501_vm5, %v2265_v49, 0.0  ;;  %3257 = vmatprep.subr.bf16.mxu1 %v3407_v2  ;;  %v2482_v49 = vrot.slane %v3726_v16, 6  ;;  %v2503_v16 = vrot.slane %v3864_v38, 4 }
0x2b80   :  { %2268 = vadd.xlane.f32.xlu1 %v2267_v50  ;;  %v2510_v50 = vsel %vm2509_vm7, %v3629_v63, %v2480_v44  ;;  %v2488_v63 = vrot.slane %v3864_v38, 3 }
0x2c0d   :  { %v2269_v43 = vpop.xlane.xlu1 %2268 }
0x2c0e   :  { %v2270_v58 = vadd.f32 %v2269_v43, %v3581_v28  ;;  %v2486_v43 = vrot.slane %v3818_v34, 4 }
0x2c50   :  { %v2257_v51 = vpop.f32.mrb[22].mxu1 }
0x2c51   :  { %v2258_v53 = vadd.f32 %v3382_v52, %v2257_v51  ;;  %v3084_v54 = vpop.f32.mrb[23].mxu1  ;;  %v2499_v52 = vrot.slane %v3772_v25, 6 }
0x2c52   :  { %v2484_v54 = vrot.slane %v3772_v25, 5  ;;  %v2512_v25 = vsel %vm2511_vm8, %v2510_v50, %v2482_v49 }
0x2c53   :  { %v2261_v56 = vmul.f32 %v3886_v47, %v2258_v53  ;;  %v2524_v53 = vsel %vm2511_vm8, %v2523_v48, %v2497_v45 }
0x2c55   :  { %v2271_v6 = vsel %vm506_vm6, %v2261_v56, -inf }
0x2c56   :  { %2272 = vmax.xlane.f32.xlu0 %v2271_v6  ;;  %v2501_v6 = vrot.slane %v3818_v34, 5 }
0x2ce3   :  { %v2273_v59 = vpop.xlane.xlu0 %2272 }
0x2ce4   :  { %v2274_v60 = vmax.f32 %v2273_v59, %v2270_v58  ;;  %v2505_v59 = vrot.slane %v3918_v46, 3 }
0x2ce6   :  { %v2283_v61 = vsub.f32 %v2270_v58, %v2274_v60  ;;  %2277 = vperm.xlu0 %3287, %v2274_v60   ;;  %v2490_v60 = vrot.slane %v3918_v46, 2 }
0x2ce8   :  { %v2284_v5 = vmul.f32 1.442695, %v2283_v61 }
0x2d65   :  { %v2278_v62 = vpop.permute.xlu0 %2277 }
0x2d66   :  { %v2280_v0 = vsub.f32 %v2261_v56, %v2278_v62  ;;  %v2525_v62 = vsel %vm2513_vm9, %v2524_v53, %v2499_v52 }
0x2d67   :  { %v2526_v34 = vsel %vm2515_vm10, %v2525_v62, %v2501_v6 }
0x2d68   :  { %v2281_v1 = vmul.f32 1.442695, %v2280_v0  ;;  %v2514_v0 = vsel %vm2513_vm9, %v2512_v25, %v2484_v54 }
0x2d6a   :  { %3367 = vpow2.f32 %v2281_v1  ;;  %v2516_v1 = vsel %vm2515_vm10, %v2514_v0, %v2486_v43 }
0x2d6b   :  { %3369 = vpow2.f32 %v2284_v5  ;;  %v2527_v5 = vsel %vm2517_vm11, %v2526_v34, %v2503_v16  ;;  %v2518_v38 = vsel %vm2517_vm11, %v2516_v1, %v2488_v63 }
0x2d74   :  { %v3368_v3 = vpop.eup %3367 }
0x2d75   :  { %v2286_v14 = vsel %vm506_vm6, %v3368_v3, 0.0  ;;  %v3370_v7 = vpop.eup %3369 }
0x2d76   :  { %2287 = vadd.xlane.f32.xlu1 %v2286_v14 }
0x2e03   :  { %v2288_v9 = vpop.xlane.xlu1 %2287 }
0x2e04   :  { %v2289_v10 = vadd.f32 %v3370_v7, %v2288_v9  ;;  %v2520_v9 = vsel %vm2519_vm12, %v2518_v38, %v2490_v60 }
0x2e06   :  { %3371 = vrcp.f32 %v2289_v10 }
0x2e10   :  { %v3372_v11 = vpop.eup %3371 }
0x2e11   :  { %2293 = vperm.xlu1 %3288, %v3372_v11   ;;  %v2298_v13 = vmul.f32 %v3372_v11, %v3370_v7  ;;  %v2528_v7 = vsel %vm2519_vm12, %v2527_v5, %v2505_v59 }
0x2e13   :  { %2301 = vperm.xlu0 %3287, %v2298_v13  }
0x2e90   :  { %v2294_v15 = vpop.permute.xlu1 %2293 }
0x2e91   :  { %v2296_v17 = vmul.f32 %v3368_v3, %v2294_v15  ;;  %v2681_v15 = vld [vmem:[%s4020_s12] ss:$0 sm:$0xff] }
0x2e93   :  { %v2297_v19 = vmul.f32 %v3886_v47, %v2296_v17  ;;  %v2302_v47 = vpop.permute.xlu0 %2301 }
0x2e94   :  { %v2304_v40 = vmul.f32 %v2302_v47, %v3581_v28 }
0x2e95   :  { %3088 = vmatmul.mubr.msk.f32.vlgmr.msra.gmra.mrb[24].mxu1 %vm233_vm3, %v2297_v19 }
0x2e96   :  { %3259 = vmatpush3.bf16.msra.mxu1 %v3541_v18  ;;  %3106 = vmatprep.mubr.msk.f32.mxu1 %vm3408_vm0, %v3409_v4 }
0x2e97   :  { %3260 = vmatprep.subr.bf16.mxu1 %v3407_v2 }
0x2e9a   :  { %3262 = vmatpush3.bf16.msra.mxu1 %v3554_v21  ;;  %v2380_v21 = vrot.slane %v3593_v37, 6  ;;  %v2530_v37 = vld [vmem:[%s4019_s11] sm:$0xff] }
0x2e9b   :  { %3263 = vmatprep.subr.bf16.mxu1 %v3407_v2  ;;  %v3269_v36 = vpack.c.bf16 %v2531_v33, %v2530_v37 }
0x2e9d   :  { %3270 = vmatprep.subr.bf16.mxu0 %v3269_v36 }
0x2e9e   :  { %3265 = vmatpush3.bf16.msra.mxu1 %v3567_v24  ;;  %3272 = vmatpush3.bf16.msra.mxu0 %v3269_v36 }
0x2e9f   :  { %3266 = vmatprep.subr.bf16.mxu1 %v3407_v2  ;;  %3274 = vmatprep.subr.bf16.mxu0 %v3273_v41 }
0x2ea2   :  { %3268 = vmatpush3.bf16.msra.mxu1 %v3577_v27  ;;  %3276 = vmatpush3.bf16.msra.mxu0 %v3273_v41 }
0x2f68   :  { %v2374_v20 = vpop.f32.mrb[24].mxu1 }
0x2f69   :  { %v2375_v18 = vadd.f32 %v2374_v20, %v2304_v40  ;;  %v3089_v55 = vpop.f32.mrb[25].mxu1 }
0x2f6b   :  { %v2378_v4 = vadd.f32 %v3907_v30, %v2375_v18 }
0x2f6d   :  { %v2379_v22 = vsel %vm75_vm1, %v2378_v4, %v3918_v46 }
0x2f6e   :  { %3107 = vmatmul.mubr.msk.f32.vlgmr.msra.gmra.mrb[26].mxu1 %vm315_vm4, %v2379_v22 }
0x3041   :  { %v2451_v24 = vpop.f32.mrb[26].mxu1 }
0x3042   :  { %v2452_v23 = vadd.f32 %v2451_v24, %v2380_v21  ;;  %v3108_v2 = vpop.f32.mrb[27].mxu1 }
0x3044   :  { %2462 = vrot.lane.b32.xlu1 %v2452_v23, %s3410_s5  ;;  %v2680_v27 = vmul.f32 -1.442695, %v2452_v23 }
0x3046   :  { %3373 = vpow2.f32 %v2680_v27 }
0x3050   :  { %v3374_v28 = vpop.eup %3373 }
0x3051   :  { %v2458_v26 = vadd.f32 1.0, %v3374_v28 }
0x3053   :  { %3375 = vrcp.f32 %v2458_v26 }
0x305d   :  { %v3376_v57 = vpop.eup %3375 }
0x305e   :  { %v2472_v51 = vsub.f32 1.0, %v3376_v57  ;;  %v2478_v8 = vmul.f32 %v3376_v57, %v3918_v46 }
0x30b6   :  { %v2463_v29 = vpop.permute.xlu1 %2462 }
0x30b7   :  { %v2465_v30 = vmul.f32 %v3376_v57, %v2463_v29 }
0x30b9   :  { %2467 = vrot.lane.b32.xlu0 %v2465_v30, %s3411_s25 }
0x312b   :  { %v2468_v31 = vpop.permute.xlu0 %2467 }
0x312c   :  { %v2470_v32 = vadd.f32 %v2468_v31, %v2452_v23 }
0x312e   :  { %3377 = vtanh.f32 %v2470_v32 }
0x3138   :  { %v3378_v42 = vpop.eup %3377 }
0x3139   :  { %2474 = vrot.lane.b32.xlu1 %v3378_v42, %s3412_s17 }
0x31ab   :  { %v2475_v56 = vpop.permute.xlu1 %2474 }
0x31ac   :  { %v2477_v58 = vmul.f32 %v2475_v56, %v2472_v51 }
0x31ae   :  { %v2479_v61 = vadd.f32 %v2478_v8, %v2477_v58 }
0x31b0   :  { %v2493_v3 = vrot.slane %v2479_v61, 1  ;;  %v2507_v14 = vrot.slane %v2479_v61, 2 }
0x31b2   :  { %v2529_v10 = vsel %vm2521_vm13, %v2528_v7, %v2507_v14  ;;  %v2522_v11 = vsel %vm2521_vm13, %v2520_v9, %v2493_v3 }
0x31b3   :  { %2545 = vrot.lane.b32.xlu1 %v2529_v10, %s3412_s17  ;;  %2543 = vrot.lane.b32.xlu0 %v2522_v11, %s3412_s17 }
0x3225   :  { %v2546_v46 = vpop.permute.xlu1 %2545  ;;  %v2544_v13 = vpop.permute.xlu0 %2543 }
0x3226   :  { %3117 = vmatprep.mubr.msk.f32.mxu0 %vm75_vm1, %v2544_v13 }
0x3227   :  { %3118 = vmatmul.mubr.msk.f32.vlgmr.msra.gmra.mrb[22].mxu0 %vm75_vm1, %v2546_v46 }
0x32fa   :  { %v3119_v17 = vpop.f32.mrb[22].mxu0 }
0x32fb   :  { %v2623_v19 = vadd.f32 %v3119_v17, %v2681_v15  ;;  %v2617_v47 = vpop.f32.mrb[23].mxu0 }
0x32fc   :  { %v2618_v40 = vadd.f32 %v2681_v15, %v2617_v47 }
0x32fd   :  { %2627 = vst [vmem:[#allocation2 + $0x8] sm:$0xff] %v2623_v19 }
0x32fe   :  { %2626 = vst [vmem:[#allocation2] sm:$0xff] %v2618_v40 }
0x32ff   :  { %3394 = shalt.err (!%p3391_p4)
}
0x3300   :  { %s3395_s12 = scalar_lea.hbm %s4021_s13, 256 }
0x3301   :  { %p3396_p5 = scmp.ne.s32.totalorder %s4021_s13, %s3395_s12  ;;  %p3399_p6 = scmp.lt.u32.totalorder %s3395_s12, %s4021_s13 }
0x3303   :  { %p3401_p7 = pnand %p3399_p6, %p3396_p5 }
0x3305   :  { %3404 = shalt.err (!%p3401_p7)
}
0x3306   :  { %s3415_s6 = smov 128   ;;  %s3416_s0 = smov 8  }
0x3307   :  { %2639 = dma.vmem_to_hbm [thread:$0]  %s2634_s27, 256, %s4021_s13, [#allocation3], %s3415_s6, %s3415_s6, %s3416_s0  }
0x3308   :  { %3405 = dma.done.wait [#allocation3], 256  }
0x3309   :  { %3406 = vsyncadd [#allocation3], 4294967040 }
0x330a   :  { %2643 = vsyncpa [#allocation3], 1 }

</bundles_post_ra>
